<compile_context>
chip_gen: v6e
topology: v6e:2x2x1
jax: 0.10.0
libtpu: 0.0.40
codegen_flags: <defaults>
</compile_context>

<pallas_src>
import math
from functools import partial

import jax
import jax.numpy as jnp
from jax import lax
from jax.experimental import pallas as pl
from jax.experimental.pallas import tpu as pltpu

LN_EPS = 1e-5  # nn.LayerNorm default


def _conv_ln_gelu_kernel(img_ref, w_ref, gamma_ref, beta_ref, out_ref, *,
                         kh, kw, stride, dilation, band_h, ow):
    """One (batch, row-band) grid step.

    img_ref:   (H_pad, W_pad, Cin)   padded NHWC image of this batch element
                                     (VMEM-resident across the row-band axis).
    w_ref:     (kh*kw, Cout, Cin)    conv weight, one (Cout, Cin) matrix per tap.
    gamma_ref: (Cout, 1)             LayerNorm2d weight.
    beta_ref:  (Cout, 1)             LayerNorm2d bias.
    out_ref:   (Cout, band_h*ow)     NCHW-flat output tile (lane-dense).
    """
    rb = pl.program_id(1)
    cout = out_ref.shape[0]
    m = band_h * ow
    row0 = pl.multiple_of(rb * (band_h * stride), band_h * stride)

    acc = jnp.zeros((cout, m), jnp.float32)
    tap = 0
    for ih in range(kh):
        r0 = row0 + ih * dilation
        for iw in range(kw):
            c0 = iw * dilation                       # static offset
            if stride == 1:
                x_tap = img_ref[pl.ds(r0, band_h), pl.ds(c0, ow), :]
            else:
                x_tap = img_ref[pl.ds(r0, band_h, stride=stride),
                                pl.ds(c0, ow, stride=stride), :]
            x2d = x_tap.reshape(m, x_tap.shape[-1])  # (m, Cin)
            w_t = w_ref[tap]                         # (Cout, Cin)
            # (Cout, Cin) . (m, Cin)^T -> (Cout, m); f32 accumulation on MXU.
            acc = acc + lax.dot_general(
                w_t, x2d,
                dimension_numbers=(((1,), (1,)), ((), ())),
                preferred_element_type=jnp.float32)
            tap += 1

    # LayerNorm2d: normalize over channels (axis 0) per spatial position.
    # E[x^2] - mean^2 -> the two reductions are independent (shorter crit path).
    mean = jnp.mean(acc, axis=0, keepdims=True)
    mean_sq = jnp.mean(acc * acc, axis=0, keepdims=True)
    var = mean_sq - mean * mean                       # biased variance
    y = (acc - mean) * lax.rsqrt(var + LN_EPS)
    y = y * gamma_ref[...] + beta_ref[...]

    # exact erf GELU, matching torch.nn.GELU().
    out = 0.5 * y * (1.0 + lax.erf(y * (1.0 / math.sqrt(2.0))))
    out_ref[...] = out.astype(out_ref.dtype)


def _choose_band_rows(OH, OW, max_lanes=4096):
    """Largest divisor of OH whose flattened band (rows*OW) is a multiple of
    128 lanes and not too large; fall back to the full image per grid step."""
    divisors = [bh for bh in range(1, OH + 1) if OH % bh == 0]
    lane_ok = [bh for bh in divisors if (bh * OW) % 128 == 0]
    if not lane_ok:
        return OH                     # block == full trailing dim (always legal)
    capped = [bh for bh in lane_ok if bh * OW <= max_lanes]
    return max(capped) if capped else min(lane_ok)


def conv_bn_act(x_nchw, weight, gamma, beta, *, stride=1, padding=1, dilation=1,
                compute_dtype=jnp.bfloat16, out_dtype=None, band_rows=None):
    """Fused Conv2d(bias=False) -> LayerNorm2d -> GELU.

    x_nchw: (N, Cin, H, W), weight: (Cout, Cin, kh, kw), gamma/beta: (Cout,).
    compute_dtype: dtype of the MXU operands (bf16 on v6e/v7x halves input DMA);
    accumulation and the LayerNorm/GELU epilogue are always float32.
    """
    N, Cin, H, W = x_nchw.shape
    Cout, _, kh, kw = weight.shape
    s, p, d = stride, padding, dilation
    out_dtype = x_nchw.dtype if out_dtype is None else out_dtype

    OH = (H + 2 * p - d * (kh - 1) - 1) // s + 1
    OW = (W + 2 * p - d * (kw - 1) - 1) // s + 1

    # --- cheap glue (1x data, no im2col): NCHW -> NHWC, spatial zero-pad ---
    x = jnp.transpose(x_nchw, (0, 2, 3, 1))
    x = jnp.pad(x, ((0, 0), (p, p), (p, p), (0, 0))).astype(compute_dtype)
    Hp, Wp = H + 2 * p, W + 2 * p

    # conv weight folded to one (Cout, Cin) matrix per spatial tap.
    w_taps = (jnp.transpose(weight, (2, 3, 0, 1))
              .reshape(kh * kw, Cout, Cin).astype(compute_dtype))
    gamma2 = gamma.reshape(Cout, 1).astype(jnp.float32)
    beta2 = beta.reshape(Cout, 1).astype(jnp.float32)

    band_h = _choose_band_rows(OH, OW) if band_rows is None else band_rows
    assert OH % band_h == 0, "band_rows must divide OH"
    RB = OH // band_h
    m = band_h * OW

    kernel = partial(_conv_ln_gelu_kernel, kh=kh, kw=kw, stride=s, dilation=d,
                     band_h=band_h, ow=OW)

    # Advisory cost estimate so XLA schedules the surrounding glue sensibly.
    c_item = jnp.dtype(compute_dtype).itemsize
    o_item = jnp.dtype(out_dtype).itemsize
    bytes_accessed = (N * Hp * Wp * Cin * c_item
                      + kh * kw * Cout * Cin * c_item
                      + N * Cout * OH * OW * o_item
                      + 2 * Cout * 4)
    cost = pl.CostEstimate(flops=2 * N * OH * OW * kh * kw * Cin * Cout,
                           transcendentals=N * OH * OW * Cout,
                           bytes_accessed=int(bytes_accessed))

    # VMEM budget: double-buffered resident image + output tile + weights +
    # epilogue temporaries.  Raise the scoped limit only if needed and cap at
    # v7x's 64 MiB physical VMEM so the same tiling stays portable.
    vmem_est = (2 * Hp * Wp * Cin * c_item + 2 * Cout * m * o_item
                + 2 * kh * kw * Cout * Cin * c_item + 8 * Cout * m * 4)
    vmem_limit = None
    if vmem_est > 30 * 1024 * 1024:
        vmem_limit = int(min(vmem_est + (8 << 20), 64 * 1024 * 1024))
    # NOTE: if the padded image plane itself ever exceeds the VMEM budget
    # (huge H*W*Cin), switch the image input to memory_space=pl.ANY + manual
    # row-band make_async_copy double-buffering; not needed at these shapes.

    out_flat = pl.pallas_call(
        kernel,
        out_shape=jax.ShapeDtypeStruct((N, Cout, OH * OW), out_dtype),
        grid_spec=pltpu.PrefetchScalarGridSpec(
            num_scalar_prefetch=0,
            # Row-band axis innermost: the image block index repeats across it,
            # so the padded image is DMA'd into VMEM once per batch element.
            grid=(N, RB),
            in_specs=[
                pl.BlockSpec((None, Hp, Wp, Cin), lambda n, rb: (n, 0, 0, 0)),
                pl.BlockSpec((kh * kw, Cout, Cin), lambda n, rb: (0, 0, 0)),
                pl.BlockSpec((Cout, 1), lambda n, rb: (0, 0)),
                pl.BlockSpec((Cout, 1), lambda n, rb: (0, 0)),
            ],
            # Lane-dense transposed output tile, written NCHW-flat.
            out_specs=pl.BlockSpec((None, Cout, m), lambda n, rb: (n, 0, rb)),
        ),
        compiler_params=pltpu.CompilerParams(
            dimension_semantics=("parallel", "arbitrary"),
            vmem_limit_bytes=vmem_limit),
        cost_estimate=cost,
    )(x, w_taps, gamma2, beta2)

    return out_flat.reshape(N, Cout, OH, OW)


def reference(x_nchw, weight, gamma, beta, *, stride=1, padding=1, dilation=1):
    """Pure-JAX reference (same semantics as the PyTorch module)."""
    y = lax.conv_general_dilated(
        x_nchw.astype(jnp.float32), weight.astype(jnp.float32),
        window_strides=(stride, stride),
        padding=[(padding, padding), (padding, padding)],
        rhs_dilation=(dilation, dilation),
        dimension_numbers=("NCHW", "OIHW", "NCHW"))
    mean = jnp.mean(y, axis=1, keepdims=True)
    c = y - mean
    var = jnp.mean(c * c, axis=1, keepdims=True)
    yn = c * lax.rsqrt(var + LN_EPS)
    yn = yn * gamma.reshape(1, -1, 1, 1) + beta.reshape(1, -1, 1, 1)
    return 0.5 * yn * (1.0 + lax.erf(yn / math.sqrt(2.0)))


if __name__ == "__main__":
    # ConvBnAct(in_channel=4, out_channel=32, kernel=3, stride=1, padding=1)
    N, Cin, H, W = 2, 4, 16, 16
    Cout, kh, kw = 32, 3, 3

    key = jax.random.PRNGKey(0)
    k_x, k_w, k_g, k_b = jax.random.split(key, 4)
    x = jax.random.normal(k_x, (N, Cin, H, W), dtype=jnp.float32)
    weight = jax.random.normal(k_w, (Cout, Cin, kh, kw), dtype=jnp.float32) * 0.1
    gamma = 1.0 + 0.05 * jax.random.normal(k_g, (Cout,), dtype=jnp.float32)
    beta = 0.05 * jax.random.normal(k_b, (Cout,), dtype=jnp.float32)

    ref = reference(x, weight, gamma, beta, stride=1, padding=1, dilation=1)

    # 1) exactness check: f32 MXU operands -> matches the f32 reference tightly.
    out_f32 = conv_bn_act(x, weight, gamma, beta, stride=1, padding=1,
                          dilation=1, compute_dtype=jnp.float32)
    out_f32 = jax.block_until_ready(out_f32)
    assert out_f32.shape == (N, Cout, H, W)
    assert jnp.max(jnp.abs(out_f32 - ref)) < 5e-4, "f32 kernel mismatch vs reference"

    # 2) fast path: bf16 MXU operands (f32 accumulate + f32 LN/GELU).  Compare
    #    against the reference evaluated on bf16-rounded operands, which
    #    isolates kernel correctness from the deliberate quantization.
    out_bf16 = conv_bn_act(x, weight, gamma, beta, stride=1, padding=1,
                           dilation=1, compute_dtype=jnp.bfloat16)
    out_bf16 = jax.block_until_ready(out_bf16)
    x_r = x.astype(jnp.bfloat16).astype(jnp.float32)
    w_r = weight.astype(jnp.bfloat16).astype(jnp.float32)
    ref_bf16 = reference(x_r, w_r, gamma, beta, stride=1, padding=1, dilation=1)
    assert out_bf16.shape == (N, Cout, H, W)
    assert jnp.max(jnp.abs(out_bf16 - ref_bf16)) < 2e-3, "bf16 kernel mismatch"

    print("KERNEL_OK")
</pallas_src>

<mosaic_0001>
module attributes {stable_mosaic.version = 11 : i64} {
  func.func @_conv_ln_gelu_kernel(%arg0: i32, %arg1: i32, %arg2: memref<1x18x18x4xf32, #tpu.memory_space<vmem>>, %arg3: memref<9x32x4xf32, #tpu.memory_space<vmem>>, %arg4: memref<32x1xf32, #tpu.memory_space<vmem>>, %arg5: memref<32x1xf32, #tpu.memory_space<vmem>>, %arg6: memref<1x32x256xf32, #tpu.memory_space<vmem>>) attributes {dimension_semantics = [#tpu.dimension_semantics<parallel>, #tpu.dimension_semantics<arbitrary>], iteration_bounds = array<i64: 2, 1>, scalar_prefetch = 0 : i64, scratch_operands = 0 : i64, tpu.core_type = #tpu.core_type<tc>, window_params = [{transform_indices = @transform_0, window_bounds = array<i64: 1, 18, 18, 4>}, {pipeline_mode = #tpu.pipeline_mode<synchronous>, transform_indices = @transform_1, window_bounds = array<i64: 9, 32, 4>}, {pipeline_mode = #tpu.pipeline_mode<synchronous>, transform_indices = @transform_2, window_bounds = array<i64: 32, 1>}, {pipeline_mode = #tpu.pipeline_mode<synchronous>, transform_indices = @transform_3, window_bounds = array<i64: 32, 1>}, {transform_indices = @transform_4, window_bounds = array<i64: 1, 32, 256>}]} {
    %c16_i32 = arith.constant 16 : i32
    %0 = arith.muli %arg1, %c16_i32 : i32
    %1 = tpu.assume_multiple %0, 16 : i32
    %cst = arith.constant 0.000000e+00 : f32
    %2 = vector.broadcast %cst : f32 to vector<32x256xf32>
    %c0_i32 = arith.constant 0 : i32
    %3 = arith.addi %1, %c0_i32 : i32
    %c0 = arith.constant 0 : index
    %4 = arith.index_cast %3 : i32 to index
    %c0_0 = arith.constant 0 : index
    %c0_1 = arith.constant 0 : index
    %5 = vector.load %arg2[%c0, %4, %c0_0, %c0_1] : memref<1x18x18x4xf32, #tpu.memory_space<vmem>>, vector<1x16x16x4xf32>
    %6 = vector.shape_cast %5 : vector<1x16x16x4xf32> to vector<16x16x4xf32>
    %7 = vector.shape_cast %6 : vector<16x16x4xf32> to vector<256x4xf32>
    %c0_2 = arith.constant 0 : index
    %c0_3 = arith.constant 0 : index
    %c0_4 = arith.constant 0 : index
    %8 = vector.load %arg3[%c0_2, %c0_3, %c0_4] : memref<9x32x4xf32, #tpu.memory_space<vmem>>, vector<1x32x4xf32>
    %9 = vector.shape_cast %8 : vector<1x32x4xf32> to vector<32x4xf32>
    %cst_5 = arith.constant dense<0.000000e+00> : vector<32x256xf32>
    %10 = tpu.matmul %9, %7, %cst_5 {dimension_numbers = #tpu.dot_dimension_numbers<[1], [1], [0], [0], [0, 0, 1, 0], [], []>} : vector<32x4xf32>, vector<256x4xf32>, vector<32x256xf32> -> vector<32x256xf32>
    %11 = arith.addf %2, %10 : vector<32x256xf32>
    %c0_6 = arith.constant 0 : index
    %12 = arith.index_cast %3 : i32 to index
    %c1 = arith.constant 1 : index
    %c0_7 = arith.constant 0 : index
    %13 = vector.load %arg2[%c0_6, %12, %c1, %c0_7] : memref<1x18x18x4xf32, #tpu.memory_space<vmem>>, vector<1x16x16x4xf32>
    %14 = vector.shape_cast %13 : vector<1x16x16x4xf32> to vector<16x16x4xf32>
    %15 = vector.shape_cast %14 : vector<16x16x4xf32> to vector<256x4xf32>
    %c1_8 = arith.constant 1 : index
    %c0_9 = arith.constant 0 : index
    %c0_10 = arith.constant 0 : index
    %16 = vector.load %arg3[%c1_8, %c0_9, %c0_10] : memref<9x32x4xf32, #tpu.memory_space<vmem>>, vector<1x32x4xf32>
    %17 = vector.shape_cast %16 : vector<1x32x4xf32> to vector<32x4xf32>
    %cst_11 = arith.constant dense<0.000000e+00> : vector<32x256xf32>
    %18 = tpu.matmul %17, %15, %cst_11 {dimension_numbers = #tpu.dot_dimension_numbers<[1], [1], [0], [0], [0, 0, 1, 0], [], []>} : vector<32x4xf32>, vector<256x4xf32>, vector<32x256xf32> -> vector<32x256xf32>
    %19 = arith.addf %11, %18 : vector<32x256xf32>
    %c0_12 = arith.constant 0 : index
    %20 = arith.index_cast %3 : i32 to index
    %c2 = arith.constant 2 : index
    %c0_13 = arith.constant 0 : index
    %21 = vector.load %arg2[%c0_12, %20, %c2, %c0_13] : memref<1x18x18x4xf32, #tpu.memory_space<vmem>>, vector<1x16x16x4xf32>
    %22 = vector.shape_cast %21 : vector<1x16x16x4xf32> to vector<16x16x4xf32>
    %23 = vector.shape_cast %22 : vector<16x16x4xf32> to vector<256x4xf32>
    %c2_14 = arith.constant 2 : index
    %c0_15 = arith.constant 0 : index
    %c0_16 = arith.constant 0 : index
    %24 = vector.load %arg3[%c2_14, %c0_15, %c0_16] : memref<9x32x4xf32, #tpu.memory_space<vmem>>, vector<1x32x4xf32>
    %25 = vector.shape_cast %24 : vector<1x32x4xf32> to vector<32x4xf32>
    %cst_17 = arith.constant dense<0.000000e+00> : vector<32x256xf32>
    %26 = tpu.matmul %25, %23, %cst_17 {dimension_numbers = #tpu.dot_dimension_numbers<[1], [1], [0], [0], [0, 0, 1, 0], [], []>} : vector<32x4xf32>, vector<256x4xf32>, vector<32x256xf32> -> vector<32x256xf32>
    %27 = arith.addf %19, %26 : vector<32x256xf32>
    %c1_i32 = arith.constant 1 : i32
    %28 = arith.addi %1, %c1_i32 : i32
    %c0_18 = arith.constant 0 : index
    %29 = arith.index_cast %28 : i32 to index
    %c0_19 = arith.constant 0 : index
    %c0_20 = arith.constant 0 : index
    %30 = vector.load %arg2[%c0_18, %29, %c0_19, %c0_20] : memref<1x18x18x4xf32, #tpu.memory_space<vmem>>, vector<1x16x16x4xf32>
    %31 = vector.shape_cast %30 : vector<1x16x16x4xf32> to vector<16x16x4xf32>
    %32 = vector.shape_cast %31 : vector<16x16x4xf32> to vector<256x4xf32>
    %c3 = arith.constant 3 : index
    %c0_21 = arith.constant 0 : index
    %c0_22 = arith.constant 0 : index
    %33 = vector.load %arg3[%c3, %c0_21, %c0_22] : memref<9x32x4xf32, #tpu.memory_space<vmem>>, vector<1x32x4xf32>
    %34 = vector.shape_cast %33 : vector<1x32x4xf32> to vector<32x4xf32>
    %cst_23 = arith.constant dense<0.000000e+00> : vector<32x256xf32>
    %35 = tpu.matmul %34, %32, %cst_23 {dimension_numbers = #tpu.dot_dimension_numbers<[1], [1], [0], [0], [0, 0, 1, 0], [], []>} : vector<32x4xf32>, vector<256x4xf32>, vector<32x256xf32> -> vector<32x256xf32>
    %36 = arith.addf %27, %35 : vector<32x256xf32>
    %c0_24 = arith.constant 0 : index
    %37 = arith.index_cast %28 : i32 to index
    %c1_25 = arith.constant 1 : index
    %c0_26 = arith.constant 0 : index
    %38 = vector.load %arg2[%c0_24, %37, %c1_25, %c0_26] : memref<1x18x18x4xf32, #tpu.memory_space<vmem>>, vector<1x16x16x4xf32>
    %39 = vector.shape_cast %38 : vector<1x16x16x4xf32> to vector<16x16x4xf32>
    %40 = vector.shape_cast %39 : vector<16x16x4xf32> to vector<256x4xf32>
    %c4 = arith.constant 4 : index
    %c0_27 = arith.constant 0 : index
    %c0_28 = arith.constant 0 : index
    %41 = vector.load %arg3[%c4, %c0_27, %c0_28] : memref<9x32x4xf32, #tpu.memory_space<vmem>>, vector<1x32x4xf32>
    %42 = vector.shape_cast %41 : vector<1x32x4xf32> to vector<32x4xf32>
    %cst_29 = arith.constant dense<0.000000e+00> : vector<32x256xf32>
    %43 = tpu.matmul %42, %40, %cst_29 {dimension_numbers = #tpu.dot_dimension_numbers<[1], [1], [0], [0], [0, 0, 1, 0], [], []>} : vector<32x4xf32>, vector<256x4xf32>, vector<32x256xf32> -> vector<32x256xf32>
    %44 = arith.addf %36, %43 : vector<32x256xf32>
    %c0_30 = arith.constant 0 : index
    %45 = arith.index_cast %28 : i32 to index
    %c2_31 = arith.constant 2 : index
    %c0_32 = arith.constant 0 : index
    %46 = vector.load %arg2[%c0_30, %45, %c2_31, %c0_32] : memref<1x18x18x4xf32, #tpu.memory_space<vmem>>, vector<1x16x16x4xf32>
    %47 = vector.shape_cast %46 : vector<1x16x16x4xf32> to vector<16x16x4xf32>
    %48 = vector.shape_cast %47 : vector<16x16x4xf32> to vector<256x4xf32>
    %c5 = arith.constant 5 : index
    %c0_33 = arith.constant 0 : index
    %c0_34 = arith.constant 0 : index
    %49 = vector.load %arg3[%c5, %c0_33, %c0_34] : memref<9x32x4xf32, #tpu.memory_space<vmem>>, vector<1x32x4xf32>
    %50 = vector.shape_cast %49 : vector<1x32x4xf32> to vector<32x4xf32>
    %cst_35 = arith.constant dense<0.000000e+00> : vector<32x256xf32>
    %51 = tpu.matmul %50, %48, %cst_35 {dimension_numbers = #tpu.dot_dimension_numbers<[1], [1], [0], [0], [0, 0, 1, 0], [], []>} : vector<32x4xf32>, vector<256x4xf32>, vector<32x256xf32> -> vector<32x256xf32>
    %52 = arith.addf %44, %51 : vector<32x256xf32>
    %c2_i32 = arith.constant 2 : i32
    %53 = arith.addi %1, %c2_i32 : i32
    %c0_36 = arith.constant 0 : index
    %54 = arith.index_cast %53 : i32 to index
    %c0_37 = arith.constant 0 : index
    %c0_38 = arith.constant 0 : index
    %55 = vector.load %arg2[%c0_36, %54, %c0_37, %c0_38] : memref<1x18x18x4xf32, #tpu.memory_space<vmem>>, vector<1x16x16x4xf32>
    %56 = vector.shape_cast %55 : vector<1x16x16x4xf32> to vector<16x16x4xf32>
    %57 = vector.shape_cast %56 : vector<16x16x4xf32> to vector<256x4xf32>
    %c6 = arith.constant 6 : index
    %c0_39 = arith.constant 0 : index
    %c0_40 = arith.constant 0 : index
    %58 = vector.load %arg3[%c6, %c0_39, %c0_40] : memref<9x32x4xf32, #tpu.memory_space<vmem>>, vector<1x32x4xf32>
    %59 = vector.shape_cast %58 : vector<1x32x4xf32> to vector<32x4xf32>
    %cst_41 = arith.constant dense<0.000000e+00> : vector<32x256xf32>
    %60 = tpu.matmul %59, %57, %cst_41 {dimension_numbers = #tpu.dot_dimension_numbers<[1], [1], [0], [0], [0, 0, 1, 0], [], []>} : vector<32x4xf32>, vector<256x4xf32>, vector<32x256xf32> -> vector<32x256xf32>
    %61 = arith.addf %52, %60 : vector<32x256xf32>
    %c0_42 = arith.constant 0 : index
    %62 = arith.index_cast %53 : i32 to index
    %c1_43 = arith.constant 1 : index
    %c0_44 = arith.constant 0 : index
    %63 = vector.load %arg2[%c0_42, %62, %c1_43, %c0_44] : memref<1x18x18x4xf32, #tpu.memory_space<vmem>>, vector<1x16x16x4xf32>
    %64 = vector.shape_cast %63 : vector<1x16x16x4xf32> to vector<16x16x4xf32>
    %65 = vector.shape_cast %64 : vector<16x16x4xf32> to vector<256x4xf32>
    %c7 = arith.constant 7 : index
    %c0_45 = arith.constant 0 : index
    %c0_46 = arith.constant 0 : index
    %66 = vector.load %arg3[%c7, %c0_45, %c0_46] : memref<9x32x4xf32, #tpu.memory_space<vmem>>, vector<1x32x4xf32>
    %67 = vector.shape_cast %66 : vector<1x32x4xf32> to vector<32x4xf32>
    %cst_47 = arith.constant dense<0.000000e+00> : vector<32x256xf32>
    %68 = tpu.matmul %67, %65, %cst_47 {dimension_numbers = #tpu.dot_dimension_numbers<[1], [1], [0], [0], [0, 0, 1, 0], [], []>} : vector<32x4xf32>, vector<256x4xf32>, vector<32x256xf32> -> vector<32x256xf32>
    %69 = arith.addf %61, %68 : vector<32x256xf32>
    %c0_48 = arith.constant 0 : index
    %70 = arith.index_cast %53 : i32 to index
    %c2_49 = arith.constant 2 : index
    %c0_50 = arith.constant 0 : index
    %71 = vector.load %arg2[%c0_48, %70, %c2_49, %c0_50] : memref<1x18x18x4xf32, #tpu.memory_space<vmem>>, vector<1x16x16x4xf32>
    %72 = vector.shape_cast %71 : vector<1x16x16x4xf32> to vector<16x16x4xf32>
    %73 = vector.shape_cast %72 : vector<16x16x4xf32> to vector<256x4xf32>
    %c8 = arith.constant 8 : index
    %c0_51 = arith.constant 0 : index
    %c0_52 = arith.constant 0 : index
    %74 = vector.load %arg3[%c8, %c0_51, %c0_52] : memref<9x32x4xf32, #tpu.memory_space<vmem>>, vector<1x32x4xf32>
    %75 = vector.shape_cast %74 : vector<1x32x4xf32> to vector<32x4xf32>
    %cst_53 = arith.constant dense<0.000000e+00> : vector<32x256xf32>
    %76 = tpu.matmul %75, %73, %cst_53 {dimension_numbers = #tpu.dot_dimension_numbers<[1], [1], [0], [0], [0, 0, 1, 0], [], []>} : vector<32x4xf32>, vector<256x4xf32>, vector<32x256xf32> -> vector<32x256xf32>
    %77 = arith.addf %69, %76 : vector<32x256xf32>
    %cst_54 = arith.constant dense<0.000000e+00> : vector<256xf32>
    %78 = vector.multi_reduction <add>, %77, %cst_54 [0] : vector<32x256xf32> to vector<256xf32>
    %79 = vector.shape_cast %78 : vector<256xf32> to vector<1x256xf32>
    %cst_55 = arith.constant 3.200000e+01 : f32
    %80 = vector.broadcast %cst_55 : f32 to vector<1x256xf32>
    %81 = arith.divf %79, %80 : vector<1x256xf32>
    %82 = arith.mulf %77, %77 : vector<32x256xf32>
    %cst_56 = arith.constant dense<0.000000e+00> : vector<256xf32>
    %83 = vector.multi_reduction <add>, %82, %cst_56 [0] : vector<32x256xf32> to vector<256xf32>
    %84 = vector.shape_cast %83 : vector<256xf32> to vector<1x256xf32>
    %cst_57 = arith.constant 3.200000e+01 : f32
    %85 = vector.broadcast %cst_57 : f32 to vector<1x256xf32>
    %86 = arith.divf %84, %85 : vector<1x256xf32>
    %87 = arith.mulf %81, %81 : vector<1x256xf32>
    %88 = arith.subf %86, %87 : vector<1x256xf32>
    %89 = vector.broadcast %81 : vector<1x256xf32> to vector<32x256xf32>
    %90 = arith.subf %77, %89 : vector<32x256xf32>
    %cst_58 = arith.constant 9.99999974E-6 : f32
    %91 = vector.broadcast %cst_58 : f32 to vector<1x256xf32>
    %92 = arith.addf %88, %91 : vector<1x256xf32>
    %93 = math.rsqrt %92 : vector<1x256xf32>
    %94 = vector.broadcast %93 : vector<1x256xf32> to vector<32x256xf32>
    %95 = arith.mulf %90, %94 : vector<32x256xf32>
    %c0_59 = arith.constant 0 : index
    %c0_60 = arith.constant 0 : index
    %96 = vector.load %arg4[%c0_59, %c0_60] : memref<32x1xf32, #tpu.memory_space<vmem>>, vector<32x1xf32>
    %97 = vector.broadcast %96 : vector<32x1xf32> to vector<32x256xf32>
    %98 = arith.mulf %95, %97 : vector<32x256xf32>
    %c0_61 = arith.constant 0 : index
    %c0_62 = arith.constant 0 : index
    %99 = vector.load %arg5[%c0_61, %c0_62] : memref<32x1xf32, #tpu.memory_space<vmem>>, vector<32x1xf32>
    %100 = vector.broadcast %99 : vector<32x1xf32> to vector<32x256xf32>
    %101 = arith.addf %98, %100 : vector<32x256xf32>
    %cst_63 = arith.constant 5.000000e-01 : f32
    %102 = vector.broadcast %cst_63 : f32 to vector<32x256xf32>
    %103 = arith.mulf %102, %101 : vector<32x256xf32>
    %cst_64 = arith.constant 0.707106769 : f32
    %104 = vector.broadcast %cst_64 : f32 to vector<32x256xf32>
    %105 = arith.mulf %101, %104 : vector<32x256xf32>
    %106 = math.erf %105 : vector<32x256xf32>
    %cst_65 = arith.constant 1.000000e+00 : f32
    %107 = vector.broadcast %cst_65 : f32 to vector<32x256xf32>
    %108 = arith.addf %107, %106 : vector<32x256xf32>
    %109 = arith.mulf %103, %108 : vector<32x256xf32>
    %c0_66 = arith.constant 0 : index
    %c0_67 = arith.constant 0 : index
    %c0_68 = arith.constant 0 : index
    %110 = vector.load %arg6[%c0_66, %c0_67, %c0_68] : memref<1x32x256xf32, #tpu.memory_space<vmem>>, vector<1x32x256xf32>
    %111 = vector.shape_cast %110 : vector<1x32x256xf32> to vector<32x256xf32>
    %112 = vector.shape_cast %109 : vector<32x256xf32> to vector<1x32x256xf32>
    tpu.vector_store %arg6[%c0_66, %c0_67, %c0_68], %112 {strides = array<i32>} : memref<1x32x256xf32, #tpu.memory_space<vmem>>, vector<1x32x256xf32>,
    return
  }
  func.func @transform_0(%arg0: i32, %arg1: i32) -> (i32, i32, i32, i32) {
    %c0_i32 = arith.constant 0 : i32
    %c0_i32_0 = arith.constant 0 : i32
    %c0_i32_1 = arith.constant 0 : i32
    %c0_i32_2 = arith.constant 0 : i32
    return %arg0, %c0_i32, %c0_i32_0, %c0_i32_1 : i32, i32, i32, i32
  }
  func.func @transform_1(%arg0: i32, %arg1: i32) -> (i32, i32, i32) {
    %c0_i32 = arith.constant 0 : i32
    %c0_i32_0 = arith.constant 0 : i32
    %c0_i32_1 = arith.constant 0 : i32
    %c0_i32_2 = arith.constant 0 : i32
    return %c0_i32, %c0_i32_0, %c0_i32_1 : i32, i32, i32
  }
  func.func @transform_2(%arg0: i32, %arg1: i32) -> (i32, i32) {
    %c0_i32 = arith.constant 0 : i32
    %c0_i32_0 = arith.constant 0 : i32
    %c0_i32_1 = arith.constant 0 : i32
    return %c0_i32, %c0_i32_0 : i32, i32
  }
  func.func @transform_3(%arg0: i32, %arg1: i32) -> (i32, i32) {
    %c0_i32 = arith.constant 0 : i32
    %c0_i32_0 = arith.constant 0 : i32
    %c0_i32_1 = arith.constant 0 : i32
    return %c0_i32, %c0_i32_0 : i32, i32
  }
  func.func @transform_4(%arg0: i32, %arg1: i32) -> (i32, i32, i32) {
    %c0_i32 = arith.constant 0 : i32
    %c0_i32_0 = arith.constant 0 : i32
    return %arg0, %c0_i32, %arg1 : i32, i32, i32
  }
}

</mosaic_0001>

<bundles_post_ra>
// kernel: tpu_custom_call.1
= control target key start
LH: loop header
LB: loop body
LE: loop exit
PB: predicated region body
PF: predicated region fallthrough
CT: control target
= control target key end

     0   :  { %9 = vsyncpa [#allocation3], 0  ;;  %s5155_s0 = inlined_call_operand.vmem [shape: f32[2,18,18,4], index: 0, kind: input, shape index: {}]   ;;  %s5156_s1 = inlined_call_operand.vmem [shape: f32[9,32,4], index: 1, kind: input, shape index: {}]   ;;  %s5157_s2 = inlined_call_operand.vmem [shape: f32[32,1], index: 2, kind: input, shape index: {}]   ;;  %s5158_s3 = inlined_call_operand.vmem [shape: f32[32,1], index: 3, kind: input, shape index: {}]   ;;  %s5159_s4 = inlined_call_operand.hbm [shape: f32[2,32,256], index: 4, kind: output, shape index: {}]  }
   0x1   :  { %11 = vsyncpa [#allocation3 + $0x1], 0  ;;  %s3807_s15 = smov 0   ;;  %s3809_s16 = smov 0  }
   0x2   :  { %s3811_s17 = smov 0   ;;  %s3813_s18 = smov 0  }
   0x3   :  { %s3815_s19 = smov 0   ;;  %s3817_s20 = smov 0  }
   0x4 LB: > { %s2666_s21 = sadd.s32 4294967295, %s3776_s20   ;;  %s2667_s22 = sadd.s32 4294967294, %s3776_s20   ;;  %s3776_s20 = sphi %s3817_s20, %s17_s20   ;;  %s3772_s19 = sphi %s3815_s19, %s5309_s19   ;;  %s3768_s18 = sphi %s3813_s18, %s5308_s18   ;;  %s3764_s17 = sphi %s3811_s17, %s5307_s17   ;;  %s3760_s16 = sphi %s3809_s16, %s5306_s16   ;;  %s3756_s15 = sphi %s3807_s15, %s5305_s15  }
   0x5   : > { %s29_s23 = sadd.s32 1, %s3772_s19  ;;  %s127_s24 = sadd.s32 1, %s3764_s17 }
   0x6   : > { %p31_p0 = scmp.ge.s32.totalorder %s29_s23, 2  ;;  %p137_p1 = scmp.ne.s32.totalorder %s3764_s17, %s3760_s16 }
   0x7   : > { %p138_p2 = scmp.eq.s32.totalorder %s2666_s21, 1  ;;  %p143_p3 = scmp.ne.s32.totalorder %s3760_s16, %s3756_s15 }
   0x8   : > { %s5311_s23 = smov (%p31_p0, %s29_s23), 0  ;;  %p144_p5 = scmp.eq.s32.totalorder %s2667_s22, 1 }
   0x9   : > { %p3847_p4 = por %p138_p2, %p137_p1  ;;  %s122_s26 = ssub.s32 %s3772_s19, %s5311_s23 }
   0xa   : > { %p2670_p6 = scmp.ge.s32.totalorder %s3776_s20, 1  ;;  %p125_p7 = scmp.eq.s32.totalorder %s122_s26, 0 }
   0xb   : > { %p3854_p8 = por %p144_p5, %p143_p3  ;;  %p179_p9 = scmp.lt.s32.totalorder %s3776_s20, 3 }
   0xc   : > { %s3860_s28 = scalar_select %p125_p7, %s3764_s17, %s127_s24  }
   0xd   : > { %p180_p10 = pnand %p2670_p6, %p179_p9 }
   0xf   : > { %183 = sbr.rel (%p180_p10) target bundleno = 636 (0x27c), region = 36 }
  0x14   : > { %p205_p11 = scmp.lt.s32.totalorder %s3768_s18, 1  ;;  %vm287_vm0 = vcmask 31744   ;;  %v3866_v0 = vld [vmem:[%s5156_s1 + $0x20] sm:$0xff]  ;;  %s3226_s5 = sshll.u32 %s3768_s18, 10 }
  0x15   : > { %v3871_v1 = vld [vmem:[%s5156_s1] sm:$0xff]  ;;  %3259 = vmatprep.mubr.msk.f32.mxu0 %vm287_vm0, %v3866_v0  ;;  %s3779_s12 = smov [#allocation2]  }
  0x16   : > { %3299 = vmatprep.mubr.msk.f32.mxu1 %vm287_vm0, %v3871_v1  ;;  %s206_s7 = scalar_select %p205_p11, %s3768_s18, 1 }
  0x17   : > { %s5101_s18 = scalar_lea.hbm %s5159_s4, %s3226_s5  ;;  %s3704_s13 = sshll.u32 %s3779_s12, 4  ;;  %s3705_s13 = int_to_ptr.vmem [resolvable:$false] %s3704_s13 }
  0x18   : > { %s3619_s8 = smul.u32 432, %s206_s7  ;;  %s3706_s14 = scalar_lea.vmem %s3705_s13, 2048 }
  0x1a   : > { %s3881_s11 = scalar_lea.vmem %s5155_s0, %s3619_s8 }
  0x1b   : > { %v3884_v2 = vld [vmem:[%s3881_s11 + $0x171] sm:$0xff]  ;;  %v3900_v6 = vld [vmem:[%s3881_s11 + $0x169] sm:$0xff]  ;;  %v3920_v10 = vld [vmem:[%s3881_s11 + $0x159] sm:$0xff] }
  0x1c   : > { %v3887_v3 = vld [vmem:[%s3881_s11 + $0x170] sm:$0xff]  ;;  %3227 = vmatprep.subr.msk.mxu0 %vm287_vm0, %v3884_v2  ;;  %v3903_v7 = vld [vmem:[%s3881_s11 + $0x168] sm:$0xff]  ;;  %v3923_v11 = vld [vmem:[%s3881_s11 + $0x158] sm:$0xff] }
  0x1d   : > { %5213 = vst [vmem:[#allocation5_spill] sm:$0xff] %v3887_v3  ;;  %v3890_v4 = vld [vmem:[%s3881_s11 + $0xb1] sm:$0xff]  ;;  %3267 = vmatprep.subr.msk.mxu1 %vm287_vm0, %v3887_v3  ;;  %5215 = vst [vmem:[#allocation7_spill] sm:$0xff] %v3903_v7  ;;  %v3914_v8 = vld [vmem:[%s3881_s11 + $0xa9] sm:$0xff] }
  0x1e   : > { %v3897_v5 = vld [vmem:[%s3881_s11 + $0xb0] sm:$0xff]  ;;  %3228 = vmatpush3.xpose.msk.msra.mxu0 %vm287_vm0, %v3890_v4  ;;  %v3917_v9 = vld [vmem:[%s3881_s11 + $0xa8] sm:$0xff]  ;;  %5217 = vst [vmem:[#allocation9_spill] sm:$0xff] %v3923_v11  ;;  %v3934_v12 = vld [vmem:[%s3881_s11 + $0x99] sm:$0xff] }
  0x1f   : > { %5214 = vst [vmem:[#allocation6_spill] sm:$0xff] %v3897_v5  ;;  %3268 = vmatpush3.xpose.msk.msra.mxu1 %vm287_vm0, %v3897_v5  ;;  %3229 = vmatprep.subr.msk.mxu0 %vm287_vm0, %v3900_v6  ;;  %5216 = vst [vmem:[#allocation8_spill] sm:$0xff] %v3917_v9  ;;  %v3937_v13 = vld [vmem:[%s3881_s11 + $0x98] sm:$0xff]  ;;  %v3943_v15 = vld [vmem:[%s3881_s11 + $0x150] sm:$0xff] }
  0x20   : > { %3269 = vmatprep.subr.msk.mxu1 %vm287_vm0, %v3903_v7  ;;  %5218 = vst [vmem:[#allocation10_spill] sm:$0xff] %v3937_v13  ;;  %v3940_v14 = vld [vmem:[%s3881_s11 + $0x151] sm:$0xff]  ;;  %5219 = vst [vmem:[#allocation11_spill] sm:$0xff] %v3943_v15  ;;  %v3960_v18 = vld [vmem:[%s3881_s11 + $0x141] sm:$0xff] }
  0x21   : > { %v3954_v16 = vld [vmem:[%s3881_s11 + $0x91] sm:$0xff]  ;;  %v3963_v19 = vld [vmem:[%s3881_s11 + $0x140] sm:$0xff]  ;;  %v4000_v26 = vld [vmem:[%s3881_s11 + $0x129] sm:$0xff] }
  0x22   : > { %3230 = vmatpush3.xpose.msk.msra.mxu0 %vm287_vm0, %v3914_v8  ;;  %v3957_v17 = vld [vmem:[%s3881_s11 + $0x90] sm:$0xff]  ;;  %5221 = vst [vmem:[#allocation13_spill] sm:$0xff] %v3963_v19  ;;  %v3974_v20 = vld [vmem:[%s3881_s11 + $0x81] sm:$0xff]  ;;  %v3980_v22 = vld [vmem:[%s3881_s11 + $0x139] sm:$0xff] }
  0x23   : > { %3270 = vmatpush3.xpose.msk.msra.mxu1 %vm287_vm0, %v3917_v9  ;;  %3231 = vmatprep.subr.msk.mxu0 %vm287_vm0, %v3920_v10  ;;  %5220 = vst [vmem:[#allocation12_spill] sm:$0xff] %v3957_v17  ;;  %v3977_v21 = vld [vmem:[%s3881_s11 + $0x80] sm:$0xff]  ;;  %v3983_v23 = vld [vmem:[%s3881_s11 + $0x138] sm:$0xff]  ;;  %v4003_v27 = vld [vmem:[%s3881_s11 + $0x128] sm:$0xff] }
  0x24   : > { %3271 = vmatprep.subr.msk.mxu1 %vm287_vm0, %v3923_v11  ;;  %5222 = vst [vmem:[#allocation14_spill] sm:$0xff] %v3977_v21  ;;  %5223 = vst [vmem:[#allocation15_spill] sm:$0xff] %v3983_v23  ;;  %v3994_v24 = vld [vmem:[%s3881_s11 + $0x79] sm:$0xff]  ;;  %v4014_v28 = vld [vmem:[%s3881_s11 + $0x69] sm:$0xff] }
  0x25   : > { %v3997_v25 = vld [vmem:[%s3881_s11 + $0x78] sm:$0xff]  ;;  %5225 = vst [vmem:[#allocation17_spill] sm:$0xff] %v4003_v27  ;;  %v4017_v29 = vld [vmem:[%s3881_s11 + $0x68] sm:$0xff]  ;;  %v4023_v31 = vld [vmem:[%s3881_s11 + $0x120] sm:$0xff] }
  0x26   : > { %3232 = vmatpush3.xpose.msk.msra.mxu0 %vm287_vm0, %v3934_v12  ;;  %5224 = vst [vmem:[#allocation16_spill] sm:$0xff] %v3997_v25  ;;  %5226 = vst [vmem:[#allocation18_spill] sm:$0xff] %v4017_v29  ;;  %v4020_v30 = vld [vmem:[%s3881_s11 + $0x121] sm:$0xff]  ;;  %v4040_v34 = vld [vmem:[%s3881_s11 + $0x111] sm:$0xff] }
  0x27   : > { %3272 = vmatpush3.xpose.msk.msra.mxu1 %vm287_vm0, %v3937_v13  ;;  %3233 = vmatprep.subr.msk.mxu0 %vm287_vm0, %v3940_v14  ;;  %5227 = vst [vmem:[#allocation19_spill] sm:$0xff] %v4023_v31  ;;  %v4034_v32 = vld [vmem:[%s3881_s11 + $0x61] sm:$0xff]  ;;  %v4043_v35 = vld [vmem:[%s3881_s11 + $0x110] sm:$0xff]  ;;  %v4080_v42 = vld [vmem:[%s3881_s11 + $0xf9] sm:$0xff] }
  0x28   : > { %3273 = vmatprep.subr.msk.mxu1 %vm287_vm0, %v3943_v15  ;;  %v4037_v33 = vld [vmem:[%s3881_s11 + $0x60] sm:$0xff]  ;;  %5229 = vst [vmem:[#allocation21_spill] sm:$0xff] %v4043_v35  ;;  %v4054_v36 = vld [vmem:[%s3881_s11 + $0x51] sm:$0xff]  ;;  %v4060_v38 = vld [vmem:[%s3881_s11 + $0x109] sm:$0xff] }
  0x29   : > { %5228 = vst [vmem:[#allocation20_spill] sm:$0xff] %v4037_v33  ;;  %v4057_v37 = vld [vmem:[%s3881_s11 + $0x50] sm:$0xff]  ;;  %v4063_v39 = vld [vmem:[%s3881_s11 + $0x108] sm:$0xff]  ;;  %v4083_v43 = vld [vmem:[%s3881_s11 + $0xf8] sm:$0xff] }
  0x2a   : > { %3234 = vmatpush3.xpose.msk.msra.mxu0 %vm287_vm0, %v3954_v16  ;;  %5230 = vst [vmem:[#allocation22_spill] sm:$0xff] %v4057_v37  ;;  %5231 = vst [vmem:[#allocation23_spill] sm:$0xff] %v4063_v39  ;;  %v4074_v40 = vld [vmem:[%s3881_s11 + $0x49] sm:$0xff]  ;;  %v4094_v44 = vld [vmem:[%s3881_s11 + $0x39] sm:$0xff] }
  0x2b   : > { %3274 = vmatpush3.xpose.msk.msra.mxu1 %vm287_vm0, %v3957_v17  ;;  %3235 = vmatprep.subr.msk.mxu0 %vm287_vm0, %v3960_v18  ;;  %v4077_v41 = vld [vmem:[%s3881_s11 + $0x48] sm:$0xff]  ;;  %5233 = vst [vmem:[#allocation25_spill] sm:$0xff] %v4083_v43  ;;  %v4097_v45 = vld [vmem:[%s3881_s11 + $0x38] sm:$0xff]  ;;  %v4103_v47 = vld [vmem:[%s3881_s11 + $0xf0] sm:$0xff] }
  0x2c   : > { %3275 = vmatprep.subr.msk.mxu1 %vm287_vm0, %v3963_v19  ;;  %5232 = vst [vmem:[#allocation24_spill] sm:$0xff] %v4077_v41  ;;  %5234 = vst [vmem:[#allocation26_spill] sm:$0xff] %v4097_v45  ;;  %v4100_v46 = vld [vmem:[%s3881_s11 + $0xf1] sm:$0xff]  ;;  %v4120_v50 = vld [vmem:[%s3881_s11 + $0xe1] sm:$0xff] }
  0x2d   : > { %5235 = vst [vmem:[#allocation27_spill] sm:$0xff] %v4103_v47  ;;  %v4114_v48 = vld [vmem:[%s3881_s11 + $0x31] sm:$0xff]  ;;  %5238 = vst [vmem:[#allocation30_spill] sm:$0xff] %v4120_v50  ;;  %v4123_v51 = vld [vmem:[%s3881_s11 + $0xe0] sm:$0xff] }
  0x2e   : > { %3236 = vmatpush3.xpose.msk.msra.mxu0 %vm287_vm0, %v3974_v20  ;;  %5236 = vst [vmem:[#allocation28_spill] sm:$0xff] %v4114_v48  ;;  %v4117_v49 = vld [vmem:[%s3881_s11 + $0x30] sm:$0xff]  ;;  %v4134_v52 = vld [vmem:[%s3881_s11 + $0x21] sm:$0xff]  ;;  %v4140_v54 = vld [vmem:[%s3881_s11 + $0xd9] sm:$0xff] }
  0x2f   : > { %3276 = vmatpush3.xpose.msk.msra.mxu1 %vm287_vm0, %v3977_v21  ;;  %3237 = vmatprep.subr.msk.mxu0 %vm287_vm0, %v3980_v22  ;;  %5237 = vst [vmem:[#allocation29_spill] sm:$0xff] %v4117_v49  ;;  %5239 = vst [vmem:[#allocation31_spill] sm:$0xff] %v4134_v52  ;;  %v4137_v53 = vld [vmem:[%s3881_s11 + $0x20] sm:$0xff]  ;;  %v4143_v55 = vld [vmem:[%s3881_s11 + $0xd8] sm:$0xff] }
  0x30   : > { %3277 = vmatprep.subr.msk.mxu1 %vm287_vm0, %v3983_v23  ;;  %5240 = vst [vmem:[#allocation32_spill] sm:$0xff] %v4140_v54  ;;  %v4154_v56 = vld [vmem:[%s3881_s11 + $0x19] sm:$0xff]  ;;  %v4160_v58 = vld [vmem:[%s3881_s11 + $0xc9] sm:$0xff]  ;;  %v4176_v62 = vld [vmem:[%s3881_s11 + $0xc1] sm:$0xff] }
  0x31   : > { %5241 = vst [vmem:[#allocation33_spill] sm:$0xff] %v4154_v56  ;;  %v4157_v57 = vld [vmem:[%s3881_s11 + $0x18] sm:$0xff]  ;;  %v4163_v59 = vld [vmem:[%s3881_s11 + $0xc8] sm:$0xff]  ;;  %v4179_v63 = vld [vmem:[%s3881_s11 + $0xc0] sm:$0xff] }
  0x32   : > { %3238 = vmatpush3.xpose.msk.msra.mxu0 %vm287_vm0, %v3994_v24  ;;  %5242 = vst [vmem:[#allocation34_spill] sm:$0xff] %v4163_v59  ;;  %v251_v60 = vld [vmem:[%s3881_s11 + $0x9] sm:$0xff]  ;;  %5243 = vst [vmem:[#allocation35_spill] sm:$0xff] %v4179_v63 }
  0x33   : > { %3278 = vmatpush3.xpose.msk.msra.mxu1 %vm287_vm0, %v3997_v25  ;;  %3239 = vmatprep.subr.msk.mxu0 %vm287_vm0, %v4000_v26  ;;  %v215_v61 = vld [vmem:[%s3881_s11 + $0x8] sm:$0xff] }
  0x34   : > { %3279 = vmatprep.subr.msk.mxu1 %vm287_vm0, %v4003_v27 }
  0x36   : > { %3240 = vmatpush3.xpose.msk.msra.mxu0 %vm287_vm0, %v4014_v28 }
  0x37   : > { %3280 = vmatpush3.xpose.msk.msra.mxu1 %vm287_vm0, %v4017_v29  ;;  %3241 = vmatprep.subr.msk.mxu0 %vm287_vm0, %v4020_v30 }
  0x38   : > { %3281 = vmatprep.subr.msk.mxu1 %vm287_vm0, %v4023_v31 }
  0x3a   : > { %3242 = vmatpush3.xpose.msk.msra.mxu0 %vm287_vm0, %v4034_v32 }
  0x3b   : > { %3282 = vmatpush3.xpose.msk.msra.mxu1 %vm287_vm0, %v4037_v33  ;;  %3243 = vmatprep.subr.msk.mxu0 %vm287_vm0, %v4040_v34 }
  0x3c   : > { %3283 = vmatprep.subr.msk.mxu1 %vm287_vm0, %v4043_v35 }
  0x3e   : > { %3244 = vmatpush3.xpose.msk.msra.mxu0 %vm287_vm0, %v4054_v36 }
  0x3f   : > { %3284 = vmatpush3.xpose.msk.msra.mxu1 %vm287_vm0, %v4057_v37  ;;  %3245 = vmatprep.subr.msk.mxu0 %vm287_vm0, %v4060_v38 }
  0x40   : > { %3285 = vmatprep.subr.msk.mxu1 %vm287_vm0, %v4063_v39 }
  0x42   : > { %3246 = vmatpush3.xpose.msk.msra.mxu0 %vm287_vm0, %v4074_v40 }
  0x43   : > { %3286 = vmatpush3.xpose.msk.msra.mxu1 %vm287_vm0, %v4077_v41  ;;  %3247 = vmatprep.subr.msk.mxu0 %vm287_vm0, %v4080_v42 }
  0x44   : > { %3287 = vmatprep.subr.msk.mxu1 %vm287_vm0, %v4083_v43 }
  0x46   : > { %3248 = vmatpush3.xpose.msk.msra.mxu0 %vm287_vm0, %v4094_v44 }
  0x47   : > { %3288 = vmatpush3.xpose.msk.msra.mxu1 %vm287_vm0, %v4097_v45  ;;  %3249 = vmatprep.subr.msk.mxu0 %vm287_vm0, %v4100_v46 }
  0x48   : > { %3289 = vmatprep.subr.msk.mxu1 %vm287_vm0, %v4103_v47 }
  0x4a   : > { %3250 = vmatpush3.xpose.msk.msra.mxu0 %vm287_vm0, %v4114_v48  ;;  %v4208_v48 = vld [vmem:[%s3881_s11 + $0x180] sm:$0xff] }
  0x4b   : > { %3290 = vmatpush3.xpose.msk.msra.mxu1 %vm287_vm0, %v4117_v49  ;;  %3251 = vmatprep.subr.msk.mxu0 %vm287_vm0, %v4120_v50  ;;  %v4193_v50 = vld [vmem:[%s3881_s11 + $0x188] sm:$0xff]  ;;  %5245 = vst [vmem:[#allocation37_spill] sm:$0xff] %v4208_v48 }
  0x4c   : > { %3291 = vmatprep.subr.msk.mxu1 %vm287_vm0, %v4123_v51  ;;  %5244 = vst [vmem:[#allocation36_spill] sm:$0xff] %v4193_v50 }
  0x4e   : > { %3252 = vmatpush3.xpose.msk.msra.mxu0 %vm287_vm0, %v4134_v52  ;;  %v4190_v52 = vld [vmem:[%s3881_s11 + $0x172] sm:$0xff] }
  0x4f   : > { %3292 = vmatpush3.xpose.msk.msra.mxu1 %vm287_vm0, %v4137_v53  ;;  %3253 = vmatprep.subr.msk.mxu0 %vm287_vm0, %v4140_v54  ;;  %v214_v54 = vld [vmem:[%s3881_s11] sm:$0xff] }
  0x50   : > { %3293 = vmatprep.subr.msk.mxu1 %vm287_vm0, %v4143_v55 }
  0x52   : > { %3254 = vmatpush3.xpose.msk.msra.mxu0 %vm287_vm0, %v4154_v56  ;;  %v250_v56 = vld [vmem:[%s3881_s11 + $0x1] sm:$0xff] }
  0x53   : > { %3294 = vmatpush3.xpose.msk.msra.mxu1 %vm287_vm0, %v4157_v57  ;;  %3255 = vmatprep.subr.msk.mxu0 %vm287_vm0, %v4160_v58 }
  0x54   : > { %3295 = vmatprep.subr.msk.mxu1 %vm287_vm0, %v4163_v59 }
  0x56   : > { %3256 = vmatpush3.xpose.msk.msra.mxu0 %vm287_vm0, %v251_v60  ;;  %v4202_v60 = vld [vmem:[%s3881_s11 + $0xb2] sm:$0xff] }
  0x57   : > { %3296 = vmatpush3.xpose.msk.msra.mxu1 %vm287_vm0, %v215_v61  ;;  %3257 = vmatprep.subr.msk.mxu0 %vm287_vm0, %v4176_v62  ;;  %v4205_v61 = vld [vmem:[%s3881_s11 + $0x16a] sm:$0xff] }
  0x58   : > { %3297 = vmatprep.subr.msk.mxu1 %vm287_vm0, %v4179_v63 }
  0x5a   : > { %3258 = vmatpush3.xpose.msk.msra.mxu0 %vm287_vm0, %v250_v56  ;;  %v247_v56 = vld [vmem:[%s5156_s1 + $0x8] sm:$0xff] }
  0x5b   : > { %3298 = vmatpush3.xpose.msk.msra.mxu1 %vm287_vm0, %v214_v54  ;;  %3307 = vmatprep.subr.msk.mxu0 %vm287_vm0, %v4190_v52  ;;  %v2674_v54 = vld [vmem:[%s5156_s1 + $0x28] sm:$0xff] }
  0x5c   : > { %3347 = vmatprep.subr.msk.mxu1 %vm287_vm0, %v4193_v50  ;;  %v4450_v50 = vld [vmem:[%s3881_s11 + $0xc2] sm:$0xff] }
  0x5d   : > { %3260 = vmatmul.mubr.msk.f32.vlgmr.msra.gmra.mxu0 %vm287_vm0, %v3866_v0  ;;  %v4229_v0 = vld [vmem:[%s3881_s11 + $0xaa] sm:$0xff] }
  0x5e   : > { %3300 = vmatmul.mubr.msk.f32.vlgmr.msra.gmra.mxu1 %vm287_vm0, %v3871_v1  ;;  %3308 = vmatpush3.xpose.msk.msra.mxu0 %vm287_vm0, %v4202_v60  ;;  %v4232_v1 = vld [vmem:[%s3881_s11 + $0x15a] sm:$0xff] }
  0x5f   : > { %3348 = vmatpush3.xpose.msk.msra.mxu1 %vm287_vm0, %v4163_v59  ;;  %3309 = vmatprep.subr.msk.mxu0 %vm287_vm0, %v4205_v61  ;;  %v2675_v59 = vld [vmem:[%s5156_s1 + $0x30] sm:$0xff] }
  0x60   : > { %3349 = vmatprep.subr.msk.mxu1 %vm287_vm0, %v4208_v48  ;;  %3261 = vmatprep.mubr.msk.f32.mxu0 %vm287_vm0, %v2674_v54  ;;  %v248_v48 = vld [vmem:[%s5156_s1 + $0x10] sm:$0xff] }
  0x61   : > { %3301 = vmatprep.mubr.msk.f32.mxu1 %vm287_vm0, %v247_v56  ;;  %3262 = vmatmul.mubr.msk.f32.gmra.mxu0 %vm287_vm0, %v2674_v54  ;;  %v4253_v54 = vld [vmem:[%s3881_s11 + $0x9a] sm:$0xff] }
  0x62   : > { %3302 = vmatmul.mubr.msk.f32.gmra.mxu1 %vm287_vm0, %v247_v56  ;;  %3310 = vmatpush3.xpose.msk.msra.mxu0 %vm287_vm0, %v4229_v0  ;;  %v4256_v56 = vld [vmem:[%s3881_s11 + $0x152] sm:$0xff] }
  0x63   : > { %3350 = vmatpush3.xpose.msk.msra.mxu1 %vm287_vm0, %v4179_v63  ;;  %3311 = vmatprep.subr.msk.mxu0 %vm287_vm0, %v4232_v1  ;;  %v2676_v63 = vld [vmem:[%s5156_s1 + $0x38] sm:$0xff] }
  0x64   : > { %3351 = vmatprep.subr.msk.mxu1 %vm287_vm0, %v3887_v3  ;;  %3263 = vmatprep.mubr.msk.f32.mxu0 %vm287_vm0, %v2675_v59  ;;  %v249_v3 = vld [vmem:[%s5156_s1 + $0x18] sm:$0xff] }
  0x65   : > { %3303 = vmatprep.mubr.msk.f32.mxu1 %vm287_vm0, %v248_v48  ;;  %3264 = vmatmul.mubr.msk.f32.gmra.mxu0 %vm287_vm0, %v2675_v59  ;;  %v4280_v59 = vld [vmem:[%s3881_s11 + $0x142] sm:$0xff] }
  0x66   : > { %3304 = vmatmul.mubr.msk.f32.gmra.mxu1 %vm287_vm0, %v248_v48  ;;  %3312 = vmatpush3.xpose.msk.msra.mxu0 %vm287_vm0, %v4253_v54  ;;  %v4277_v48 = vld [vmem:[%s3881_s11 + $0x92] sm:$0xff] }
  0x67   : > { %3352 = vmatpush3.xpose.msk.msra.mxu1 %vm287_vm0, %v3897_v5  ;;  %3313 = vmatprep.subr.msk.mxu0 %vm287_vm0, %v4256_v56  ;;  %v4289_v5 = vld [vmem:[%s5156_s1 + $0x40] sm:$0xff] }
  0x68   : > { %3353 = vmatprep.subr.msk.mxu1 %vm287_vm0, %v3903_v7  ;;  %3265 = vmatprep.mubr.msk.f32.mxu0 %vm287_vm0, %v2676_v63  ;;  %v4294_v7 = vld [vmem:[%s5156_s1 + $0x60] sm:$0xff] }
  0x69   : > { %3305 = vmatprep.mubr.msk.f32.mxu1 %vm287_vm0, %v249_v3  ;;  %3266 = vmatmul.mubr.msk.f32.gmra.mxu0 %vm287_vm0, %v2676_v63  ;;  %v4308_v63 = vld [vmem:[%s3881_s11 + $0x13a] sm:$0xff] }
  0x6a   : > { %3306 = vmatmul.mubr.msk.f32.gmra.mxu1 %vm287_vm0, %v249_v3  ;;  %3314 = vmatpush3.xpose.msk.msra.mxu0 %vm287_vm0, %v4277_v48  ;;  %v4305_v3 = vld [vmem:[%s3881_s11 + $0x82] sm:$0xff] }
  0x6b   : > { %3354 = vmatpush3.xpose.msk.msra.mxu1 %vm287_vm0, %v3917_v9  ;;  %3315 = vmatprep.subr.msk.mxu0 %vm287_vm0, %v4280_v59  ;;  %v4326_v9 = vld [vmem:[%s3881_s11 + $0x12a] sm:$0xff] }
  0x6c   : > { %3355 = vmatprep.subr.msk.mxu1 %vm287_vm0, %v3923_v11  ;;  %3339 = vmatprep.mubr.msk.f32.mxu0 %vm287_vm0, %v4289_v5  ;;  %v4323_v11 = vld [vmem:[%s3881_s11 + $0x7a] sm:$0xff] }
  0x6d   : > { %3379 = vmatprep.mubr.msk.f32.mxu1 %vm287_vm0, %v4294_v7 }
  0x6e   : > { %3316 = vmatpush3.xpose.msk.msra.mxu0 %vm287_vm0, %v4305_v3 }
  0x6f   : > { %3356 = vmatpush3.xpose.msk.msra.mxu1 %vm287_vm0, %v3937_v13  ;;  %3317 = vmatprep.subr.msk.mxu0 %vm287_vm0, %v4308_v63  ;;  %v4337_v13 = vld [vmem:[%s3881_s11 + $0x6a] sm:$0xff] }
  0x70   : > { %3357 = vmatprep.subr.msk.mxu1 %vm287_vm0, %v3943_v15  ;;  %v4340_v15 = vld [vmem:[%s3881_s11 + $0x122] sm:$0xff] }
  0x72   : > { %3318 = vmatpush3.xpose.msk.msra.mxu0 %vm287_vm0, %v4323_v11 }
  0x73   : > { %3358 = vmatpush3.xpose.msk.msra.mxu1 %vm287_vm0, %v3957_v17  ;;  %3319 = vmatprep.subr.msk.mxu0 %vm287_vm0, %v4326_v9  ;;  %v4351_v17 = vld [vmem:[%s3881_s11 + $0x62] sm:$0xff] }
  0x74   : > { %3359 = vmatprep.subr.msk.mxu1 %vm287_vm0, %v3963_v19  ;;  %v4354_v19 = vld [vmem:[%s3881_s11 + $0x112] sm:$0xff] }
  0x76   : > { %3320 = vmatpush3.xpose.msk.msra.mxu0 %vm287_vm0, %v4337_v13 }
  0x77   : > { %3360 = vmatpush3.xpose.msk.msra.mxu1 %vm287_vm0, %v3977_v21  ;;  %3321 = vmatprep.subr.msk.mxu0 %vm287_vm0, %v4340_v15  ;;  %v4365_v21 = vld [vmem:[%s3881_s11 + $0x52] sm:$0xff] }
  0x78   : > { %3361 = vmatprep.subr.msk.mxu1 %vm287_vm0, %v3983_v23  ;;  %5246 = vst [vmem:[#allocation38_spill] sm:$0xff] %v4365_v21  ;;  %v4368_v23 = vld [vmem:[%s3881_s11 + $0x10a] sm:$0xff] }
  0x79   : > { %5247 = vst [vmem:[#allocation39_spill] sm:$0xff] %v4368_v23 }
  0x7a   : > { %3322 = vmatpush3.xpose.msk.msra.mxu0 %vm287_vm0, %v4351_v17 }
  0x7b   : > { %3362 = vmatpush3.xpose.msk.msra.mxu1 %vm287_vm0, %v3997_v25  ;;  %3323 = vmatprep.subr.msk.mxu0 %vm287_vm0, %v4354_v19  ;;  %v4379_v25 = vld [vmem:[%s3881_s11 + $0x4a] sm:$0xff] }
  0x7c   : > { %3363 = vmatprep.subr.msk.mxu1 %vm287_vm0, %v4003_v27  ;;  %5248 = vst [vmem:[#allocation40_spill] sm:$0xff] %v4379_v25  ;;  %v4382_v27 = vld [vmem:[%s3881_s11 + $0xfa] sm:$0xff] }
  0x7d   : > { %5249 = vst [vmem:[#allocation41_spill] sm:$0xff] %v4382_v27 }
  0x7e   : > { %3324 = vmatpush3.xpose.msk.msra.mxu0 %vm287_vm0, %v4365_v21 }
  0x7f   : > { %3364 = vmatpush3.xpose.msk.msra.mxu1 %vm287_vm0, %v4017_v29  ;;  %3325 = vmatprep.subr.msk.mxu0 %vm287_vm0, %v4368_v23  ;;  %v4393_v29 = vld [vmem:[%s3881_s11 + $0x3a] sm:$0xff] }
  0x80   : > { %3365 = vmatprep.subr.msk.mxu1 %vm287_vm0, %v4023_v31  ;;  %5250 = vst [vmem:[#allocation42_spill] sm:$0xff] %v4393_v29  ;;  %v4396_v31 = vld [vmem:[%s3881_s11 + $0xf2] sm:$0xff] }
  0x81   : > { %5251 = vst [vmem:[#allocation43_spill] sm:$0xff] %v4396_v31 }
  0x82   : > { %3326 = vmatpush3.xpose.msk.msra.mxu0 %vm287_vm0, %v4379_v25 }
  0x83   : > { %3366 = vmatpush3.xpose.msk.msra.mxu1 %vm287_vm0, %v4037_v33  ;;  %3327 = vmatprep.subr.msk.mxu0 %vm287_vm0, %v4382_v27  ;;  %v4407_v33 = vld [vmem:[%s3881_s11 + $0x32] sm:$0xff] }
  0x84   : > { %3367 = vmatprep.subr.msk.mxu1 %vm287_vm0, %v4043_v35  ;;  %5252 = vst [vmem:[#allocation44_spill] sm:$0xff] %v4407_v33  ;;  %v4410_v35 = vld [vmem:[%s3881_s11 + $0xe2] sm:$0xff] }
  0x86   : > { %3328 = vmatpush3.xpose.msk.msra.mxu0 %vm287_vm0, %v4393_v29 }
  0x87   : > { %3368 = vmatpush3.xpose.msk.msra.mxu1 %vm287_vm0, %v4057_v37  ;;  %3329 = vmatprep.subr.msk.mxu0 %vm287_vm0, %v4396_v31  ;;  %v4421_v37 = vld [vmem:[%s3881_s11 + $0x22] sm:$0xff] }
  0x88   : > { %3369 = vmatprep.subr.msk.mxu1 %vm287_vm0, %v4063_v39  ;;  %v4424_v39 = vld [vmem:[%s3881_s11 + $0xda] sm:$0xff] }
  0x8a   : > { %3330 = vmatpush3.xpose.msk.msra.mxu0 %vm287_vm0, %v4407_v33 }
  0x8b   : > { %3370 = vmatpush3.xpose.msk.msra.mxu1 %vm287_vm0, %v4077_v41  ;;  %3331 = vmatprep.subr.msk.mxu0 %vm287_vm0, %v4410_v35  ;;  %v4438_v41 = vld [vmem:[%s3881_s11 + $0xca] sm:$0xff] }
  0x8c   : > { %3371 = vmatprep.subr.msk.mxu1 %vm287_vm0, %v4083_v43  ;;  %v4435_v43 = vld [vmem:[%s3881_s11 + $0x1a] sm:$0xff] }
  0x8d   : > { %5253 = vst [vmem:[#allocation45_spill] sm:$0xff] %v4435_v43 }
  0x8e   : > { %3332 = vmatpush3.xpose.msk.msra.mxu0 %vm287_vm0, %v4421_v37 }
  0x8f   : > { %3372 = vmatpush3.xpose.msk.msra.mxu1 %vm287_vm0, %v4097_v45  ;;  %3333 = vmatprep.subr.msk.mxu0 %vm287_vm0, %v4424_v39  ;;  %v683_v45 = vld [vmem:[%s3881_s11 + $0xa] sm:$0xff] }
  0x90   : > { %3373 = vmatprep.subr.msk.mxu1 %vm287_vm0, %v4103_v47  ;;  %v4461_v47 = vld [vmem:[%s3881_s11 + $0x189] sm:$0xff] }
  0x92   : > { %3334 = vmatpush3.xpose.msk.msra.mxu0 %vm287_vm0, %v4435_v43  ;;  %v4464_v43 = vld [vmem:[%s3881_s11 + $0x18a] sm:$0xff] }
  0x93   : > { %3374 = vmatpush3.xpose.msk.msra.mxu1 %vm287_vm0, %v4117_v49  ;;  %3335 = vmatprep.subr.msk.mxu0 %vm287_vm0, %v4438_v41  ;;  %v682_v49 = vld [vmem:[%s3881_s11 + $0x2] sm:$0xff] }
  0x94   : > { %3375 = vmatprep.subr.msk.mxu1 %vm287_vm0, %v4123_v51 }
  0x96   : > { %3336 = vmatpush3.xpose.msk.msra.mxu0 %vm287_vm0, %v683_v45  ;;  %v2750_v45 = vld [vmem:[%s5156_s1 + $0x48] sm:$0xff] }
  0x97   : > { %3376 = vmatpush3.xpose.msk.msra.mxu1 %vm287_vm0, %v4137_v53  ;;  %3337 = vmatprep.subr.msk.mxu0 %vm287_vm0, %v4450_v50  ;;  %v4477_v53 = vld [vmem:[%s3881_s11 + $0x181] sm:$0xff] }
  0x98   : > { %3377 = vmatprep.subr.msk.mxu1 %vm287_vm0, %v4143_v55 }
  0x9a   : > { %3338 = vmatpush3.xpose.msk.msra.mxu0 %vm287_vm0, %v682_v49  ;;  %v4484_v49 = vld [vmem:[%s3881_s11 + $0x182] sm:$0xff] }
  0x9b   : > { %3378 = vmatpush3.xpose.msk.msra.mxu1 %vm287_vm0, %v4157_v57  ;;  %3387 = vmatprep.subr.msk.mxu0 %vm287_vm0, %v4461_v47  ;;  %v2822_v57 = vld [vmem:[%s5156_s1 + $0x68] sm:$0xff] }
  0x9c   : > { %3427 = vmatprep.subr.msk.mxu1 %vm287_vm0, %v4464_v43 }
  0x9d   : > { %3340 = vmatmul.mubr.msk.f32.vlgmr.msra.gmra.mxu0 %vm287_vm0, %v4289_v5  ;;  %v2751_v5 = vld [vmem:[%s5156_s1 + $0x50] sm:$0xff] }
  0x9e   : > { %3380 = vmatmul.mubr.msk.f32.vlgmr.msra.gmra.mxu1 %vm287_vm0, %v4294_v7  ;;  %3388 = vmatpush3.xpose.msk.msra.mxu0 %vm287_vm0, %v4160_v58  ;;  %v2823_v7 = vld [vmem:[%s5156_s1 + $0x70] sm:$0xff] }
  0x9f   : > { %3428 = vmatpush3.xpose.msk.msra.mxu1 %vm287_vm0, %v4438_v41  ;;  %3341 = vmatprep.mubr.msk.f32.mxu0 %vm287_vm0, %v2750_v45 }
  0xa0   : > { %3389 = vmatprep.subr.msk.mxu0 %vm287_vm0, %v4477_v53  ;;  %3429 = vmatprep.subr.msk.mxu1 %vm287_vm0, %v4484_v49 }
  0xa1   : > { %3381 = vmatprep.mubr.msk.f32.mxu1 %vm287_vm0, %v2822_v57  ;;  %3342 = vmatmul.mubr.msk.f32.gmra.mxu0 %vm287_vm0, %v2750_v45  ;;  %v2752_v45 = vld [vmem:[%s5156_s1 + $0x58] sm:$0xff] }
  0xa2   : > { %3382 = vmatmul.mubr.msk.f32.gmra.mxu1 %vm287_vm0, %v2822_v57  ;;  %3390 = vmatpush3.xpose.msk.msra.mxu0 %vm287_vm0, %v4176_v62  ;;  %v2824_v57 = vld [vmem:[%s5156_s1 + $0x78] sm:$0xff] }
  0xa3   : > { %3430 = vmatpush3.xpose.msk.msra.mxu1 %vm287_vm0, %v4450_v50  ;;  %3343 = vmatprep.mubr.msk.f32.mxu0 %vm287_vm0, %v2751_v5 }
  0xa4   : > { %3391 = vmatprep.subr.msk.mxu0 %vm287_vm0, %v3884_v2  ;;  %3431 = vmatprep.subr.msk.mxu1 %vm287_vm0, %v4190_v52 }
  0xa5   : > { %3383 = vmatprep.mubr.msk.f32.mxu1 %vm287_vm0, %v2823_v7  ;;  %3344 = vmatmul.mubr.msk.f32.gmra.mxu0 %vm287_vm0, %v2751_v5  ;;  %v2893_v5 = vld [vmem:[%s5156_s1 + $0x80] sm:$0xff] }
  0xa6   : > { %3384 = vmatmul.mubr.msk.f32.gmra.mxu1 %vm287_vm0, %v2823_v7  ;;  %3392 = vmatpush3.xpose.msk.msra.mxu0 %vm287_vm0, %v3890_v4  ;;  %v2965_v7 = vld [vmem:[%s5156_s1 + $0xa0] sm:$0xff] }
  0xa7   : > { %3432 = vmatpush3.xpose.msk.msra.mxu1 %vm287_vm0, %v4202_v60  ;;  %3345 = vmatprep.mubr.msk.f32.mxu0 %vm287_vm0, %v2752_v45 }
  0xa8   : > { %3393 = vmatprep.subr.msk.mxu0 %vm287_vm0, %v3900_v6  ;;  %3433 = vmatprep.subr.msk.mxu1 %vm287_vm0, %v4205_v61 }
  0xa9   : > { %3385 = vmatprep.mubr.msk.f32.mxu1 %vm287_vm0, %v2824_v57  ;;  %3346 = vmatmul.mubr.msk.f32.gmra.mxu0 %vm287_vm0, %v2752_v45  ;;  %v5254_v45 = vld [vmem:[#allocation28_spill] sm:$0xff] }
  0xaa   : > { %3386 = vmatmul.mubr.msk.f32.gmra.mxu1 %vm287_vm0, %v2824_v57  ;;  %3394 = vmatpush3.xpose.msk.msra.mxu0 %vm287_vm0, %v3914_v8  ;;  %v5255_v57 = vld [vmem:[#allocation30_spill] sm:$0xff] }
  0xab   : > { %3434 = vmatpush3.xpose.msk.msra.mxu1 %vm287_vm0, %v4229_v0  ;;  %3395 = vmatprep.subr.msk.mxu0 %vm287_vm0, %v3920_v10 }
  0xac   : > { %3435 = vmatprep.subr.msk.mxu1 %vm287_vm0, %v4232_v1  ;;  %3419 = vmatprep.mubr.msk.f32.mxu0 %vm287_vm0, %v2893_v5 }
  0xad   : > { %3459 = vmatprep.mubr.msk.f32.mxu1 %vm287_vm0, %v2965_v7 }
  0xae   : > { %3396 = vmatpush3.xpose.msk.msra.mxu0 %vm287_vm0, %v3934_v12 }
  0xaf   : > { %3436 = vmatpush3.xpose.msk.msra.mxu1 %vm287_vm0, %v4253_v54  ;;  %3397 = vmatprep.subr.msk.mxu0 %vm287_vm0, %v3940_v14 }
  0xb0   : > { %3437 = vmatprep.subr.msk.mxu1 %vm287_vm0, %v4256_v56 }
  0xb2   : > { %3398 = vmatpush3.xpose.msk.msra.mxu0 %vm287_vm0, %v3954_v16 }
  0xb3   : > { %3438 = vmatpush3.xpose.msk.msra.mxu1 %vm287_vm0, %v4277_v48  ;;  %3399 = vmatprep.subr.msk.mxu0 %vm287_vm0, %v3960_v18 }
  0xb4   : > { %3439 = vmatprep.subr.msk.mxu1 %vm287_vm0, %v4280_v59 }
  0xb6   : > { %3400 = vmatpush3.xpose.msk.msra.mxu0 %vm287_vm0, %v3974_v20 }
  0xb7   : > { %3440 = vmatpush3.xpose.msk.msra.mxu1 %vm287_vm0, %v4305_v3  ;;  %3401 = vmatprep.subr.msk.mxu0 %vm287_vm0, %v3980_v22 }
  0xb8   : > { %3441 = vmatprep.subr.msk.mxu1 %vm287_vm0, %v4308_v63 }
  0xba   : > { %3402 = vmatpush3.xpose.msk.msra.mxu0 %vm287_vm0, %v3994_v24 }
  0xbb   : > { %3442 = vmatpush3.xpose.msk.msra.mxu1 %vm287_vm0, %v4323_v11  ;;  %3403 = vmatprep.subr.msk.mxu0 %vm287_vm0, %v4000_v26 }
  0xbc   : > { %3443 = vmatprep.subr.msk.mxu1 %vm287_vm0, %v4326_v9 }
  0xbe   : > { %3404 = vmatpush3.xpose.msk.msra.mxu0 %vm287_vm0, %v4014_v28 }
  0xbf   : > { %3444 = vmatpush3.xpose.msk.msra.mxu1 %vm287_vm0, %v4337_v13  ;;  %3405 = vmatprep.subr.msk.mxu0 %vm287_vm0, %v4020_v30 }
  0xc0   : > { %3445 = vmatprep.subr.msk.mxu1 %vm287_vm0, %v4340_v15 }
  0xc2   : > { %3406 = vmatpush3.xpose.msk.msra.mxu0 %vm287_vm0, %v4034_v32 }
  0xc3   : > { %3446 = vmatpush3.xpose.msk.msra.mxu1 %vm287_vm0, %v4351_v17  ;;  %3407 = vmatprep.subr.msk.mxu0 %vm287_vm0, %v4040_v34 }
  0xc4   : > { %3447 = vmatprep.subr.msk.mxu1 %vm287_vm0, %v4354_v19 }
  0xc6   : > { %3408 = vmatpush3.xpose.msk.msra.mxu0 %vm287_vm0, %v4054_v36 }
  0xc7   : > { %3448 = vmatpush3.xpose.msk.msra.mxu1 %vm287_vm0, %v4365_v21  ;;  %3409 = vmatprep.subr.msk.mxu0 %vm287_vm0, %v4060_v38  ;;  %v3107_v21 = vld [vmem:[%s3881_s11 + $0x199] sm:$0xff] }
  0xc8   : > { %3449 = vmatprep.subr.msk.mxu1 %vm287_vm0, %v4368_v23  ;;  %v5259_v23 = vld [vmem:[#allocation45_spill] sm:$0xff] }
  0xca   : > { %3410 = vmatpush3.xpose.msk.msra.mxu0 %vm287_vm0, %v4074_v40 }
  0xcb   : > { %3450 = vmatpush3.xpose.msk.msra.mxu1 %vm287_vm0, %v4379_v25  ;;  %3411 = vmatprep.subr.msk.mxu0 %vm287_vm0, %v4080_v42  ;;  %v5258_v25 = vld [vmem:[#allocation33_spill] sm:$0xff] }
  0xcc   : > { %3451 = vmatprep.subr.msk.mxu1 %vm287_vm0, %v4382_v27  ;;  %v3108_v27 = vld [vmem:[%s3881_s11 + $0x1a1] sm:$0xff] }
  0xce   : > { %3412 = vmatpush3.xpose.msk.msra.mxu0 %vm287_vm0, %v4094_v44 }
  0xcf   : > { %3452 = vmatpush3.xpose.msk.msra.mxu1 %vm287_vm0, %v4393_v29  ;;  %3413 = vmatprep.subr.msk.mxu0 %vm287_vm0, %v4100_v46  ;;  %v5256_v29 = vld [vmem:[#allocation31_spill] sm:$0xff] }
  0xd0   : > { %3453 = vmatprep.subr.msk.mxu1 %vm287_vm0, %v4396_v31  ;;  %v5257_v31 = vld [vmem:[#allocation32_spill] sm:$0xff] }
  0xd2   : > { %3414 = vmatpush3.xpose.msk.msra.mxu0 %vm287_vm0, %v5254_v45 }
  0xd3   : > { %3454 = vmatpush3.xpose.msk.msra.mxu1 %vm287_vm0, %v4407_v33  ;;  %3415 = vmatprep.subr.msk.mxu0 %vm287_vm0, %v5255_v57  ;;  %v3036_v33 = vld [vmem:[%s3881_s11 + $0x1a0] sm:$0xff] }
  0xd4   : > { %3455 = vmatprep.subr.msk.mxu1 %vm287_vm0, %v4410_v35 }
  0xd6   : > { %3416 = vmatpush3.xpose.msk.msra.mxu0 %vm287_vm0, %v5256_v29  ;;  %v2894_v29 = vld [vmem:[%s5156_s1 + $0x88] sm:$0xff] }
  0xd7   : > { %3456 = vmatpush3.xpose.msk.msra.mxu1 %vm287_vm0, %v4421_v37  ;;  %3417 = vmatprep.subr.msk.mxu0 %vm287_vm0, %v5257_v31  ;;  %v3035_v37 = vld [vmem:[%s3881_s11 + $0x198] sm:$0xff] }
  0xd8   : > { %3457 = vmatprep.subr.msk.mxu1 %vm287_vm0, %v4424_v39 }
  0xda   : > { %3418 = vmatpush3.xpose.msk.msra.mxu0 %vm287_vm0, %v5258_v25  ;;  %v2966_v25 = vld [vmem:[%s5156_s1 + $0xa8] sm:$0xff] }
  0xdb   : > { %3458 = vmatpush3.xpose.msk.msra.mxu1 %vm287_vm0, %v5259_v23  ;;  %3467 = vmatprep.subr.msk.mxu0 %vm287_vm0, %v3036_v33  ;;  %v2895_v23 = vld [vmem:[%s5156_s1 + $0x90] sm:$0xff]  ;;  %v2896_v33 = vld [vmem:[%s5156_s1 + $0x98] sm:$0xff] }
  0xdc   : > { %3507 = vmatprep.subr.msk.mxu1 %vm287_vm0, %v3108_v27  ;;  %v2967_v27 = vld [vmem:[%s5156_s1 + $0xb0] sm:$0xff] }
  0xdd   : > { %3420 = vmatmul.mubr.msk.f32.vlgmr.msra.gmra.mxu0 %vm287_vm0, %v2893_v5  ;;  %v5263_v5 = vld [vmem:[#allocation35_spill] sm:$0xff] }
  0xde   : > { %3460 = vmatmul.mubr.msk.f32.vlgmr.msra.gmra.mxu1 %vm287_vm0, %v2965_v7  ;;  %3468 = vmatpush3.xpose.msk.msra.mxu0 %vm287_vm0, %v4123_v51  ;;  %v5261_v51 = vld [vmem:[#allocation34_spill] sm:$0xff] }
  0xdf   : > { %3508 = vmatpush3.xpose.msk.msra.mxu1 %vm287_vm0, %v5255_v57  ;;  %3421 = vmatprep.mubr.msk.f32.mxu0 %vm287_vm0, %v2894_v29  ;;  %v5265_v7 = vld [vmem:[#allocation6_spill] sm:$0xff]  ;;  %v5266_v57 = vld [vmem:[#allocation7_spill] sm:$0xff] }
  0xe0   : > { %3469 = vmatprep.subr.msk.mxu0 %vm287_vm0, %v3035_v37  ;;  %3509 = vmatprep.subr.msk.mxu1 %vm287_vm0, %v3107_v21  ;;  %v5260_v21 = vld [vmem:[#allocation36_spill] sm:$0xff] }
  0xe1   : > { %3461 = vmatprep.mubr.msk.f32.mxu1 %vm287_vm0, %v2966_v25  ;;  %3422 = vmatmul.mubr.msk.f32.gmra.mxu0 %vm287_vm0, %v2894_v29  ;;  %v5269_v29 = vld [vmem:[#allocation10_spill] sm:$0xff]  ;;  %v3040_v37 = vld [vmem:[%s5156_s1 + $0xd8] sm:$0xff] }
  0xe2   : > { %3462 = vmatmul.mubr.msk.f32.gmra.mxu1 %vm287_vm0, %v2966_v25  ;;  %3470 = vmatpush3.xpose.msk.msra.mxu0 %vm287_vm0, %v4143_v55  ;;  %v3037_v55 = vld [vmem:[%s5156_s1 + $0xc0] sm:$0xff]  ;;  %v2456_v25 = vld [vmem:[%s5157_s2 + $0x8] sm:$0xff] }
  0xe3   : > { %3510 = vmatpush3.xpose.msk.msra.mxu1 %vm287_vm0, %v5257_v31  ;;  %3423 = vmatprep.mubr.msk.f32.mxu0 %vm287_vm0, %v2895_v23  ;;  %v2968_v31 = vld [vmem:[%s5156_s1 + $0xb8] sm:$0xff] }
  0xe4   : > { %3471 = vmatprep.subr.msk.mxu0 %vm287_vm0, %v5260_v21  ;;  %3511 = vmatprep.subr.msk.mxu1 %vm287_vm0, %v4461_v47  ;;  %v5262_v47 = vld [vmem:[#allocation37_spill] sm:$0xff] }
  0xe5   : > { %3463 = vmatprep.mubr.msk.f32.mxu1 %vm287_vm0, %v2967_v27  ;;  %3424 = vmatmul.mubr.msk.f32.gmra.mxu0 %vm287_vm0, %v2895_v23 }
  0xe6   : > { %3464 = vmatmul.mubr.msk.f32.gmra.mxu1 %vm287_vm0, %v2967_v27  ;;  %3472 = vmatpush3.xpose.msk.msra.mxu0 %vm287_vm0, %v5261_v51 }
  0xe7   : > { %3512 = vmatpush3.xpose.msk.msra.mxu1 %vm287_vm0, %v4160_v58  ;;  %3425 = vmatprep.mubr.msk.f32.mxu0 %vm287_vm0, %v2896_v33  ;;  %v3109_v58 = vld [vmem:[%s5156_s1 + $0xe0] sm:$0xff] }
  0xe8   : > { %3473 = vmatprep.subr.msk.mxu0 %vm287_vm0, %v5262_v47  ;;  %3513 = vmatprep.subr.msk.mxu1 %vm287_vm0, %v4477_v53  ;;  %v5264_v53 = vld [vmem:[#allocation5_spill] sm:$0xff] }
  0xe9   : > { %3465 = vmatprep.mubr.msk.f32.mxu1 %vm287_vm0, %v2968_v31  ;;  %3426 = vmatmul.mubr.msk.f32.gmra.mxu0 %vm287_vm0, %v2896_v33 }
  0xea   : > { %3466 = vmatmul.mubr.msk.f32.gmra.mxu1 %vm287_vm0, %v2968_v31  ;;  %3474 = vmatpush3.xpose.msk.msra.mxu0 %vm287_vm0, %v5263_v5 }
  0xeb   : > { %3514 = vmatpush3.xpose.msk.msra.mxu1 %vm287_vm0, %v4176_v62  ;;  %3475 = vmatprep.subr.msk.mxu0 %vm287_vm0, %v5264_v53  ;;  %v5267_v62 = vld [vmem:[#allocation8_spill] sm:$0xff] }
  0xec   : > { %3515 = vmatprep.subr.msk.mxu1 %vm287_vm0, %v3884_v2  ;;  %3499 = vmatprep.mubr.msk.f32.mxu0 %vm287_vm0, %v3037_v55  ;;  %v5268_v2 = vld [vmem:[#allocation9_spill] sm:$0xff] }
  0xed   : > { %3539 = vmatprep.mubr.msk.f32.mxu1 %vm287_vm0, %v3109_v58 }
  0xee   : > { %3476 = vmatpush3.xpose.msk.msra.mxu0 %vm287_vm0, %v5265_v7 }
  0xef   : > { %3516 = vmatpush3.xpose.msk.msra.mxu1 %vm287_vm0, %v3890_v4  ;;  %3477 = vmatprep.subr.msk.mxu0 %vm287_vm0, %v5266_v57  ;;  %v5270_v4 = vld [vmem:[#allocation11_spill] sm:$0xff] }
  0xf0   : > { %3517 = vmatprep.subr.msk.mxu1 %vm287_vm0, %v3900_v6  ;;  %v5271_v6 = vld [vmem:[#allocation12_spill] sm:$0xff] }
  0xf2   : > { %3478 = vmatpush3.xpose.msk.msra.mxu0 %vm287_vm0, %v5267_v62 }
  0xf3   : > { %3518 = vmatpush3.xpose.msk.msra.mxu1 %vm287_vm0, %v3914_v8  ;;  %3479 = vmatprep.subr.msk.mxu0 %vm287_vm0, %v5268_v2  ;;  %v5272_v8 = vld [vmem:[#allocation13_spill] sm:$0xff] }
  0xf4   : > { %3519 = vmatprep.subr.msk.mxu1 %vm287_vm0, %v3920_v10  ;;  %v5273_v10 = vld [vmem:[#allocation14_spill] sm:$0xff] }
  0xf6   : > { %3480 = vmatpush3.xpose.msk.msra.mxu0 %vm287_vm0, %v5269_v29 }
  0xf7   : > { %3520 = vmatpush3.xpose.msk.msra.mxu1 %vm287_vm0, %v3934_v12  ;;  %3481 = vmatprep.subr.msk.mxu0 %vm287_vm0, %v5270_v4  ;;  %v5274_v12 = vld [vmem:[#allocation15_spill] sm:$0xff] }
  0xf8   : > { %3521 = vmatprep.subr.msk.mxu1 %vm287_vm0, %v3940_v14  ;;  %v5275_v14 = vld [vmem:[#allocation16_spill] sm:$0xff] }
  0xfa   : > { %3482 = vmatpush3.xpose.msk.msra.mxu0 %vm287_vm0, %v5271_v6 }
  0xfb   : > { %3522 = vmatpush3.xpose.msk.msra.mxu1 %vm287_vm0, %v3954_v16  ;;  %3483 = vmatprep.subr.msk.mxu0 %vm287_vm0, %v5272_v8  ;;  %v5276_v16 = vld [vmem:[#allocation17_spill] sm:$0xff] }
  0xfc   : > { %3523 = vmatprep.subr.msk.mxu1 %vm287_vm0, %v3960_v18  ;;  %v5277_v18 = vld [vmem:[#allocation18_spill] sm:$0xff] }
  0xfe   : > { %3484 = vmatpush3.xpose.msk.msra.mxu0 %vm287_vm0, %v5273_v10 }
  0xff   : > { %3524 = vmatpush3.xpose.msk.msra.mxu1 %vm287_vm0, %v3974_v20  ;;  %3485 = vmatprep.subr.msk.mxu0 %vm287_vm0, %v5274_v12  ;;  %v5278_v20 = vld [vmem:[#allocation19_spill] sm:$0xff] }
 0x100   : > { %3525 = vmatprep.subr.msk.mxu1 %vm287_vm0, %v3980_v22  ;;  %v5279_v22 = vld [vmem:[#allocation20_spill] sm:$0xff] }
 0x102   : > { %3486 = vmatpush3.xpose.msk.msra.mxu0 %vm287_vm0, %v5275_v14 }
 0x103   : > { %3526 = vmatpush3.xpose.msk.msra.mxu1 %vm287_vm0, %v3994_v24  ;;  %3487 = vmatprep.subr.msk.mxu0 %vm287_vm0, %v5276_v16  ;;  %v5280_v24 = vld [vmem:[#allocation21_spill] sm:$0xff] }
 0x104   : > { %3527 = vmatprep.subr.msk.mxu1 %vm287_vm0, %v4000_v26  ;;  %v5281_v26 = vld [vmem:[#allocation22_spill] sm:$0xff] }
 0x106   : > { %3488 = vmatpush3.xpose.msk.msra.mxu0 %vm287_vm0, %v5277_v18 }
 0x107   : > { %3528 = vmatpush3.xpose.msk.msra.mxu1 %vm287_vm0, %v4014_v28  ;;  %3489 = vmatprep.subr.msk.mxu0 %vm287_vm0, %v5278_v20  ;;  %v5282_v28 = vld [vmem:[#allocation23_spill] sm:$0xff] }
 0x108   : > { %3529 = vmatprep.subr.msk.mxu1 %vm287_vm0, %v4020_v30  ;;  %v5283_v30 = vld [vmem:[#allocation24_spill] sm:$0xff] }
 0x10a   : > { %3490 = vmatpush3.xpose.msk.msra.mxu0 %vm287_vm0, %v5279_v22 }
 0x10b   : > { %3530 = vmatpush3.xpose.msk.msra.mxu1 %vm287_vm0, %v4034_v32  ;;  %3491 = vmatprep.subr.msk.mxu0 %vm287_vm0, %v5280_v24  ;;  %v5284_v32 = vld [vmem:[#allocation25_spill] sm:$0xff] }
 0x10c   : > { %3531 = vmatprep.subr.msk.mxu1 %vm287_vm0, %v4040_v34  ;;  %v5285_v34 = vld [vmem:[#allocation26_spill] sm:$0xff] }
 0x10e   : > { %3492 = vmatpush3.xpose.msk.msra.mxu0 %vm287_vm0, %v5281_v26 }
 0x10f   : > { %3532 = vmatpush3.xpose.msk.msra.mxu1 %vm287_vm0, %v4054_v36  ;;  %3493 = vmatprep.subr.msk.mxu0 %vm287_vm0, %v5282_v28  ;;  %v5286_v36 = vld [vmem:[#allocation27_spill] sm:$0xff] }
 0x110   : > { %3533 = vmatprep.subr.msk.mxu1 %vm287_vm0, %v4060_v38  ;;  %v3180_v38 = vld [vmem:[%s3881_s11 + $0x1a2] sm:$0xff] }
 0x112   : > { %3494 = vmatpush3.xpose.msk.msra.mxu0 %vm287_vm0, %v5283_v30 }
 0x113   : > { %3534 = vmatpush3.xpose.msk.msra.mxu1 %vm287_vm0, %v4074_v40  ;;  %3495 = vmatprep.subr.msk.mxu0 %vm287_vm0, %v5284_v32  ;;  %v5287_v40 = vld [vmem:[#allocation29_spill] sm:$0xff] }
 0x114   : > { %3535 = vmatprep.subr.msk.mxu1 %vm287_vm0, %v4080_v42  ;;  %v3038_v42 = vld [vmem:[%s5156_s1 + $0xc8] sm:$0xff] }
 0x116   : > { %3496 = vmatpush3.xpose.msk.msra.mxu0 %vm287_vm0, %v5285_v34 }
 0x117   : > { %3536 = vmatpush3.xpose.msk.msra.mxu1 %vm287_vm0, %v4094_v44  ;;  %3497 = vmatprep.subr.msk.mxu0 %vm287_vm0, %v5286_v36  ;;  %v3179_v44 = vld [vmem:[%s3881_s11 + $0x19a] sm:$0xff]  ;;  %s202_s11 = sand.u32 1, %s3760_s16  }
 0x118   : > { %3537 = vmatprep.subr.msk.mxu1 %vm287_vm0, %v4100_v46  ;;  %v3110_v46 = vld [vmem:[%s5156_s1 + $0xe8] sm:$0xff]  ;;  %s2671_s29 = sshll.u32 %s202_s11, 6  ;;  %s5110_s9 = scalar_lea.sflag [#allocation3], %s202_s11 }
 0x119   : > { %s5089_s30 = scalar_lea.vmem [#allocation2], %s2671_s29 }
 0x11a   : > { %3498 = vmatpush3.xpose.msk.msra.mxu0 %vm287_vm0, %v5287_v40  ;;  %s2583_s6 = sshll.u32 %s5089_s30, 4  ;;  %s5103_s6 = int_to_ptr.vmem [resolvable:$true] %s2583_s6 }
 0x11b   : > { %3538 = vmatpush3.xpose.msk.msra.mxu1 %vm287_vm0, %v5254_v45  ;;  %3547 = vmatprep.subr.msk.mxu0 %vm287_vm0, %v3180_v38  ;;  %v3039_v45 = vld [vmem:[%s5156_s1 + $0xd0] sm:$0xff]  ;;  %s3700_s10 = scalar_lea.vmem %s5103_s6, 1024  ;;  %p3707_p1 = scmp.lt.s32.totalorder %s5103_s6, %s3705_s13 }
 0x11c   : > { %3587 = vmatprep.subr.msk.mxu1 %vm287_vm0, %v3180_v38  ;;  %p3701_p12 = scmp.ne.s32.totalorder %s5103_s6, %s3700_s10  ;;  %p3708_p2 = scmp.lt.s32.totalorder %s3706_s14, %s3700_s10 }
 0x11d   : > { %3500 = vmatmul.mubr.msk.f32.vlgmr.msra.gmra.mxu0 %vm287_vm0, %v3037_v55 }
 0x11e   : > { %3540 = vmatmul.mubr.msk.f32.vlgmr.msra.gmra.mxu1 %vm287_vm0, %v3109_v58  ;;  %3548 = vmatpush3.xpose.msk.msra.mxu0 %vm287_vm0, %v4410_v35  ;;  %p3702_p13 = pnand %p3701_p12, %p3847_p4  ;;  %p3709_p3 = por %p3708_p2, %p3707_p1 }
 0x11f   : > { %3603 = vmatpush3.xpose.msk.msra.mxu1 %vm287_vm0, %v4410_v35  ;;  %3501 = vmatprep.mubr.msk.f32.mxu0 %vm287_vm0, %v3038_v42  ;;  %v3111_v35 = vld [vmem:[%s5156_s1 + $0xf0] sm:$0xff] }
 0x120   : > { %3549 = vmatprep.subr.msk.mxu0 %vm287_vm0, %v3179_v44  ;;  %3588 = vmatprep.subr.msk.mxu1 %vm287_vm0, %v3179_v44  ;;  %p3703_p0 = pneg %p3702_p13 }
 0x121   : > { %3541 = vmatprep.mubr.msk.f32.mxu1 %vm287_vm0, %v3110_v46  ;;  %3502 = vmatmul.mubr.msk.f32.gmra.mxu0 %vm287_vm0, %v3038_v42 }
 0x122   : > { %3542 = vmatmul.mubr.msk.f32.gmra.mxu1 %vm287_vm0, %v3110_v46  ;;  %3550 = vmatpush3.xpose.msk.msra.mxu0 %vm287_vm0, %v4424_v39  ;;  %p3710_p5 = pnand %p3709_p3, %p3703_p0 }
 0x123   : > { %3604 = vmatpush3.xpose.msk.msra.mxu1 %vm287_vm0, %v4424_v39  ;;  %3503 = vmatprep.mubr.msk.f32.mxu0 %vm287_vm0, %v3039_v45  ;;  %v3112_v39 = vld [vmem:[%s5156_s1 + $0xf8] sm:$0xff] }
 0x124   : > { %3551 = vmatprep.subr.msk.mxu0 %vm287_vm0, %v4464_v43  ;;  %3589 = vmatprep.subr.msk.mxu1 %vm287_vm0, %v4464_v43  ;;  %v4874_v43 = vld [vmem:[%s5156_s1 + $0x100] sm:$0xff] }
 0x125   : > { %3543 = vmatprep.mubr.msk.f32.mxu1 %vm287_vm0, %v3111_v35  ;;  %3504 = vmatmul.mubr.msk.f32.gmra.mxu0 %vm287_vm0, %v3039_v45 }
 0x126   : > { %3544 = vmatmul.mubr.msk.f32.gmra.mxu1 %vm287_vm0, %v3111_v35  ;;  %3552 = vmatpush3.xpose.msk.msra.mxu0 %vm287_vm0, %v4438_v41 }
 0x127   : > { %3605 = vmatpush3.xpose.msk.msra.mxu1 %vm287_vm0, %v4438_v41  ;;  %3505 = vmatprep.mubr.msk.f32.mxu0 %vm287_vm0, %v3040_v37  ;;  %v4879_v41 = vld [vmem:[%s5156_s1 + $0x110] sm:$0xff] }
 0x128   : > { %3553 = vmatprep.subr.msk.mxu0 %vm287_vm0, %v4484_v49  ;;  %3590 = vmatprep.subr.msk.mxu1 %vm287_vm0, %v4484_v49  ;;  %v3778_v49 = vmov 0  }
 0x129   : > { %3545 = vmatprep.mubr.msk.f32.mxu1 %vm287_vm0, %v3112_v39  ;;  %3506 = vmatmul.mubr.msk.f32.gmra.mxu0 %vm287_vm0, %v3040_v37 }
 0x12a   : > { %3546 = vmatmul.mubr.msk.f32.gmra.mxu1 %vm287_vm0, %v3112_v39  ;;  %3554 = vmatpush3.xpose.msk.msra.mxu0 %vm287_vm0, %v4450_v50 }
 0x12b   : > { %3606 = vmatpush3.xpose.msk.msra.mxu1 %vm287_vm0, %v4450_v50  ;;  %3555 = vmatprep.subr.msk.mxu0 %vm287_vm0, %v4190_v52  ;;  %v2457_v50 = vld [vmem:[%s5157_s2 + $0x10] sm:$0xff] }
 0x12c   : > { %3591 = vmatprep.subr.msk.mxu1 %vm287_vm0, %v4190_v52  ;;  %3579 = vmatprep.mubr.msk.f32.mxu0 %vm287_vm0, %v4874_v43  ;;  %v2455_v52 = vld [vmem:[%s5157_s2] sm:$0xff] }
 0x12d   : > { %3583 = vmatprep.mubr.msk.f32.mxu1 %vm287_vm0, %v4879_v41  ;;  %3679 = vset.pattern.permute.xlu1 %v3778_v49 }
 0x12e   : > { %3556 = vmatpush3.xpose.msk.msra.mxu0 %vm287_vm0, %v4202_v60  ;;  %3678 = vset.pattern.permute.xlu0 %v3778_v49 }
 0x12f   : > { %3607 = vmatpush3.xpose.msk.msra.mxu1 %vm287_vm0, %v4202_v60  ;;  %3557 = vmatprep.subr.msk.mxu0 %vm287_vm0, %v4205_v61  ;;  %v2458_v60 = vld [vmem:[%s5157_s2 + $0x18] sm:$0xff] }
 0x130   : > { %3592 = vmatprep.subr.msk.mxu1 %vm287_vm0, %v4205_v61  ;;  %2471 = vperm.xlu1 %3679, %v2457_v50   ;;  %v2488_v61 = vld [vmem:[%s5158_s3 + $0x8] sm:$0xff] }
 0x131   : > { %2461 = vperm.xlu0 %3678, %v2455_v52  }
 0x132   : > { %3558 = vmatpush3.xpose.msk.msra.mxu0 %vm287_vm0, %v4229_v0 }
 0x133   : > { %3608 = vmatpush3.xpose.msk.msra.mxu1 %vm287_vm0, %v4229_v0  ;;  %3559 = vmatprep.subr.msk.mxu0 %vm287_vm0, %v4232_v1  ;;  %v2487_v0 = vld [vmem:[%s5158_s3] sm:$0xff] }
 0x134   : > { %3593 = vmatprep.subr.msk.mxu1 %vm287_vm0, %v4232_v1  ;;  %2476 = vperm.xlu1 %3679, %v2458_v60   ;;  %v2490_v1 = vld [vmem:[%s5158_s3 + $0x18] sm:$0xff] }
 0x135   : > { %2466 = vperm.xlu0 %3678, %v2456_v25  }
 0x136   : > { %3560 = vmatpush3.xpose.msk.msra.mxu0 %vm287_vm0, %v4253_v54 }
 0x137   : > { %3609 = vmatpush3.xpose.msk.msra.mxu1 %vm287_vm0, %v4253_v54  ;;  %3561 = vmatprep.subr.msk.mxu0 %vm287_vm0, %v4256_v56  ;;  %v2489_v54 = vld [vmem:[%s5158_s3 + $0x10] sm:$0xff] }
 0x138   : > { %3594 = vmatprep.subr.msk.mxu1 %vm287_vm0, %v4256_v56  ;;  %2498 = vperm.xlu1 %3679, %v2488_v61   ;;  %v5294_v56 = vld [vmem:[#allocation44_spill] sm:$0xff] }
 0x139   : > { %2493 = vperm.xlu0 %3678, %v2487_v0  }
 0x13a   : > { %3562 = vmatpush3.xpose.msk.msra.mxu0 %vm287_vm0, %v4277_v48 }
 0x13b   : > { %3610 = vmatpush3.xpose.msk.msra.mxu1 %vm287_vm0, %v4277_v48  ;;  %3563 = vmatprep.subr.msk.mxu0 %vm287_vm0, %v4280_v59  ;;  %v3182_v48 = vld [vmem:[%s5156_s1 + $0x108] sm:$0xff] }
 0x13c   : > { %3595 = vmatprep.subr.msk.mxu1 %vm287_vm0, %v4280_v59  ;;  %2508 = vperm.xlu1 %3679, %v2490_v1   ;;  %v3184_v59 = vld [vmem:[%s5156_s1 + $0x118] sm:$0xff] }
 0x13d   : > { %2503 = vperm.xlu0 %3678, %v2489_v54  }
 0x13e   : > { %3564 = vmatpush3.xpose.msk.msra.mxu0 %vm287_vm0, %v4305_v3 }
 0x13f   : > { %3611 = vmatpush3.xpose.msk.msra.mxu1 %vm287_vm0, %v4305_v3  ;;  %3565 = vmatprep.subr.msk.mxu0 %vm287_vm0, %v4308_v63  ;;  %v462_v3 = vpop.f32.mrf.mxu0 }
 0x140   : > { %3596 = vmatprep.subr.msk.mxu1 %vm287_vm0, %v4308_v63  ;;  %v659_v63 = vpop.f32.mrf.mxu1 }
 0x141   : > { %v464_v23 = vpop.f32.mrf.mxu0 }
 0x142   : > { %3566 = vmatpush3.xpose.msk.msra.mxu0 %vm287_vm0, %v4323_v11  ;;  %v661_v27 = vpop.f32.mrf.mxu1 }
 0x143   : > { %3612 = vmatpush3.xpose.msk.msra.mxu1 %vm287_vm0, %v4323_v11  ;;  %3567 = vmatprep.subr.msk.mxu0 %vm287_vm0, %v4326_v9  ;;  %v5289_v11 = vld [vmem:[#allocation39_spill] sm:$0xff]  ;;  %v468_v21 = vpop.f32.mrf.mxu0 }
 0x144   : > { %3597 = vmatprep.subr.msk.mxu1 %vm287_vm0, %v4326_v9  ;;  %v5288_v9 = vld [vmem:[#allocation38_spill] sm:$0xff]  ;;  %v665_v33 = vpop.f32.mrf.mxu1 }
 0x145   : > { %v470_v31 = vpop.f32.mrf.mxu0 }
 0x146   : > { %3568 = vmatpush3.xpose.msk.msra.mxu0 %vm287_vm0, %v4337_v13  ;;  %v667_v51 = vpop.f32.mrf.mxu1 }
 0x147   : > { %3613 = vmatpush3.xpose.msk.msra.mxu1 %vm287_vm0, %v4337_v13  ;;  %3569 = vmatprep.subr.msk.mxu0 %vm287_vm0, %v4340_v15  ;;  %v5290_v13 = vld [vmem:[#allocation40_spill] sm:$0xff]  ;;  %v474_v47 = vpop.f32.mrf.mxu0 }
 0x148   : > { %3598 = vmatprep.subr.msk.mxu1 %vm287_vm0, %v4340_v15  ;;  %v5291_v15 = vld [vmem:[#allocation41_spill] sm:$0xff]  ;;  %v671_v55 = vpop.f32.mrf.mxu1 }
 0x149   : > { %v476_v58 = vpop.f32.mrf.mxu0 }
 0x14a   : > { %3570 = vmatpush3.xpose.msk.msra.mxu0 %vm287_vm0, %v4351_v17  ;;  %v673_v5 = vpop.f32.mrf.mxu1 }
 0x14b   : > { %3614 = vmatpush3.xpose.msk.msra.mxu1 %vm287_vm0, %v4351_v17  ;;  %3571 = vmatprep.subr.msk.mxu0 %vm287_vm0, %v4354_v19  ;;  %v5292_v17 = vld [vmem:[#allocation42_spill] sm:$0xff]  ;;  %v480_v53 = vpop.f32.mrf.mxu0 }
 0x14c   : > { %3599 = vmatprep.subr.msk.mxu1 %vm287_vm0, %v4354_v19  ;;  %v5293_v19 = vld [vmem:[#allocation43_spill] sm:$0xff]  ;;  %v677_v7 = vpop.f32.mrf.mxu1 }
 0x14d   : > { %v482_v57 = vpop.f32.mrf.mxu0 }
 0x14e   : > { %3572 = vmatpush3.xpose.msk.msra.mxu0 %vm287_vm0, %v5288_v9  ;;  %v679_v62 = vpop.f32.mrf.mxu1 }
 0x14f   : > { %3615 = vmatpush3.xpose.msk.msra.mxu1 %vm287_vm0, %v5288_v9  ;;  %3573 = vmatprep.subr.msk.mxu0 %vm287_vm0, %v5289_v11 }
 0x150   : > { %3600 = vmatprep.subr.msk.mxu1 %vm287_vm0, %v5289_v11  ;;  %v660_v11 = vadd.f32 %v659_v63, %v462_v3  ;;  %v680_v3 = vadd.f32 %v679_v62, %v482_v57 }
 0x152   : > { %3574 = vmatpush3.xpose.msk.msra.mxu0 %vm287_vm0, %v5290_v13 }
 0x153   : > { %3616 = vmatpush3.xpose.msk.msra.mxu1 %vm287_vm0, %v5290_v13  ;;  %3575 = vmatprep.subr.msk.mxu0 %vm287_vm0, %v5291_v15  ;;  %v662_v13 = vadd.f32 %v661_v27, %v464_v23 }
 0x154   : > { %3601 = vmatprep.subr.msk.mxu1 %vm287_vm0, %v5291_v15  ;;  %v672_v15 = vadd.f32 %v671_v55, %v474_v47 }
 0x156   : > { %3576 = vmatpush3.xpose.msk.msra.mxu0 %vm287_vm0, %v5292_v17 }
 0x157   : > { %3617 = vmatpush3.xpose.msk.msra.mxu1 %vm287_vm0, %v5292_v17  ;;  %3577 = vmatprep.subr.msk.mxu0 %vm287_vm0, %v5293_v19  ;;  %v666_v17 = vadd.f32 %v665_v33, %v468_v21 }
 0x158   : > { %3602 = vmatprep.subr.msk.mxu1 %vm287_vm0, %v5293_v19 }
 0x15a   : > { %3578 = vmatpush3.xpose.msk.msra.mxu0 %vm287_vm0, %v5294_v56 }
 0x15b   : > { %3618 = vmatpush3.xpose.msk.msra.mxu1 %vm287_vm0, %v5294_v56  ;;  %v674_v56 = vadd.f32 %v673_v5, %v476_v58 }
 0x15d   : > { %3580 = vmatmul.mubr.msk.f32.vlgmr.msra.gmra.mxu0 %vm287_vm0, %v4874_v43  ;;  %v893_v2 = vpop.f32.mrf.mxu0 }
 0x15e   : > { %3584 = vmatmul.mubr.msk.f32.vlgmr.msra.gmra.mxu1 %vm287_vm0, %v4879_v41  ;;  %3581 = vmatprep.mubr.msk.f32.mxu0 %vm287_vm0, %v3182_v48  ;;  %v1138_v29 = vpop.f32.mrf.mxu1  ;;  %v916_v19 = vadd.f32 %v893_v2, %v660_v11 }
 0x15f   : > { %3585 = vmatprep.mubr.msk.f32.mxu1 %vm287_vm0, %v3184_v59  ;;  %v895_v4 = vpop.f32.mrf.mxu0 }
 0x160   : > { %v1140_v6 = vpop.f32.mrf.mxu1  ;;  %v1161_v27 = vadd.f32 %v1138_v29, %v916_v19 }
 0x161   : > { %3582 = vmatmul.mubr.msk.f32.gmra.mxu0 %vm287_vm0, %v3182_v48  ;;  %v899_v8 = vpop.f32.mrf.mxu0  ;;  %v678_v48 = vadd.f32 %v677_v7, %v480_v53 }
 0x162   : > { %3586 = vmatmul.mubr.msk.f32.gmra.mxu1 %vm287_vm0, %v3184_v59  ;;  %v1144_v10 = vpop.f32.mrf.mxu1  ;;  %v917_v59 = vadd.f32 %v895_v4, %v662_v13 }
 0x163   : > { %v901_v12 = vpop.f32.mrf.mxu0 }
 0x164   : > { %v1146_v14 = vpop.f32.mrf.mxu1  ;;  %v1162_v55 = vadd.f32 %v1140_v6, %v917_v59 }
 0x165   : > { %v905_v16 = vpop.f32.mrf.mxu0 }
 0x166   : > { %v1150_v18 = vpop.f32.mrf.mxu1 }
 0x167   : > { %v907_v20 = vpop.f32.mrf.mxu0 }
 0x168   : > { %v1152_v22 = vpop.f32.mrf.mxu1  ;;  %v921_v63 = vadd.f32 %v907_v20, %v674_v56 }
 0x169   : > { %v911_v24 = vpop.f32.mrf.mxu0 }
 0x16a   : > { %v1156_v26 = vpop.f32.mrf.mxu1  ;;  %v922_v23 = vadd.f32 %v911_v24, %v678_v48  ;;  %v1166_v7 = vadd.f32 %v1152_v22, %v921_v63 }
 0x16b   : > { %v913_v28 = vpop.f32.mrf.mxu0 }
 0x16c   : > { %v1158_v30 = vpop.f32.mrf.mxu1  ;;  %v923_v33 = vadd.f32 %v913_v28, %v680_v3  ;;  %v1167_v53 = vadd.f32 %v1156_v26, %v922_v23 }
 0x19d   : > { %v1380_v32 = vpop.f32.mrf.mxu0 }
 0x19e   : > { %v1622_v34 = vpop.f32.mrf.mxu1  ;;  %v1403_v58 = vadd.f32 %v1380_v32, %v1161_v27 }
 0x19f   : > { %v1382_v36 = vpop.f32.mrf.mxu0 }
 0x1a0   : > { %v1624_v38 = vpop.f32.mrf.mxu1  ;;  %v1404_v4 = vadd.f32 %v1382_v36, %v1162_v55  ;;  %v1645_v29 = vadd.f32 %v1622_v34, %v1403_v58 }
 0x1a1   : > { %v1386_v40 = vpop.f32.mrf.mxu0 }
 0x1a2   : > { %v1628_v42 = vpop.f32.mrf.mxu1  ;;  %v1646_v6 = vadd.f32 %v1624_v38, %v1404_v4 }
 0x1a3   : > { %v1388_v44 = vpop.f32.mrf.mxu0 }
 0x1a4   : > { %v5023_v46 = vpop.f32.mrf.mxu1 }
 0x1a5   : > { %5295 = vst [vmem:[#allocation28_spill] sm:$0xff] %v5023_v46  ;;  %v1392_v45 = vpop.f32.mrf.mxu0  ;;  %v920_v46 = vadd.f32 %v905_v16, %v672_v15 }
 0x1a6   : > { %v1634_v35 = vpop.f32.mrf.mxu1 }
 0x1a7   : > { %v1394_v37 = vpop.f32.mrf.mxu0  ;;  %v1165_v21 = vadd.f32 %v1150_v18, %v920_v46 }
 0x1a8   : > { %v1636_v39 = vpop.f32.mrf.mxu1 }
 0x1a9   : > { %v1398_v43 = vpop.f32.mrf.mxu0  ;;  %v1407_v16 = vadd.f32 %v1392_v45, %v1165_v21 }
 0x1aa   : > { %v1640_v41 = vpop.f32.mrf.mxu1  ;;  %v1409_v57 = vadd.f32 %v1398_v43, %v1167_v53 }
 0x1ab   : > { %v1400_v50 = vpop.f32.mrf.mxu0  ;;  %v1649_v18 = vadd.f32 %v1634_v35, %v1407_v16 }
 0x1ac   : > { %v1642_v52 = vpop.f32.mrf.mxu1  ;;  %v1651_v32 = vadd.f32 %v1640_v41, %v1409_v57 }
 0x1dd   : > { %v1867_v49 = vpop.f32.mrf.mxu0 }
 0x1de   : > { %v5025_v60 = vpop.f32.mrf.mxu1  ;;  %v1890_v28 = vadd.f32 %v1867_v49, %v1645_v29 }
 0x1df   : > { %5296 = vst [vmem:[#allocation30_spill] sm:$0xff] %v5025_v60  ;;  %v1869_v25 = vpop.f32.mrf.mxu0 }
 0x1e0   : > { %v5027_v61 = vpop.f32.mrf.mxu1  ;;  %v1891_v22 = vadd.f32 %v1869_v25, %v1646_v6 }
 0x1e1   : > { %5297 = vst [vmem:[#allocation31_spill] sm:$0xff] %v5027_v61  ;;  %v1873_v0 = vpop.f32.mrf.mxu0 }
 0x1e2   : > { %v5029_v1 = vpop.f32.mrf.mxu1 }
 0x1e3   : > { %5298 = vst [vmem:[#allocation32_spill] sm:$0xff] %v5029_v1  ;;  %v1875_v54 = vpop.f32.mrf.mxu0  ;;  %v668_v1 = vadd.f32 %v667_v51, %v470_v31  ;;  %v1168_v31 = vadd.f32 %v1158_v30, %v923_v33  ;;  %v1408_v51 = vadd.f32 %v1394_v37, %v1166_v7 }
 0x1e4   : > { %v5031_v9 = vpop.f32.mrf.mxu1 }
 0x1e5   : > { %5299 = vst [vmem:[#allocation33_spill] sm:$0xff] %v5031_v9  ;;  %v1879_v60 = vpop.f32.mrf.mxu0  ;;  %v918_v9 = vadd.f32 %v899_v8, %v666_v17  ;;  %v919_v47 = vadd.f32 %v901_v12, %v668_v1  ;;  %v1410_v20 = vadd.f32 %v1400_v50, %v1168_v31 }
 0x1e6   : > { %v2121_v61 = vpop.f32.mrf.mxu1  ;;  %v1894_v26 = vadd.f32 %v1879_v60, %v1649_v18 }
 0x1e7   : > { %v1881_v2 = vpop.f32.mrf.mxu0  ;;  %v1163_v5 = vadd.f32 %v1144_v10, %v918_v9  ;;  %v1164_v13 = vadd.f32 %v1146_v14, %v919_v47  ;;  %v1650_v10 = vadd.f32 %v1636_v39, %v1408_v51  ;;  %v5300_v14 = vld [vmem:[#allocation28_spill] sm:$0xff]  ;;  %v1652_v45 = vadd.f32 %v1642_v52, %v1410_v20 }
 0x1e8   : > { %v2123_v11 = vpop.f32.mrf.mxu1  ;;  %v5302_v50 = vld [vmem:[#allocation31_spill] sm:$0xff]  ;;  %v2136_v49 = vadd.f32 %v2121_v61, %v1894_v26 }
 0x1e9   : > { %v1405_v15 = vadd.f32 %v1386_v40, %v1163_v5  ;;  %v1885_v62 = vpop.f32.mrf.mxu0  ;;  %v1406_v12 = vadd.f32 %v1388_v44, %v1164_v13  ;;  %v1895_v37 = vadd.f32 %v1881_v2, %v1650_v10  ;;  %v5301_v44 = vld [vmem:[#allocation30_spill] sm:$0xff] }
 0x1ea   : > { %v2127_v8 = vpop.f32.mrf.mxu1  ;;  %v1896_v43 = vadd.f32 %v1885_v62, %v1651_v32  ;;  %v2132_v38 = vadd.f32 %v5301_v44, %v1890_v28  ;;  %v5303_v60 = vld [vmem:[#allocation32_spill] sm:$0xff] }
 0x1eb   : > { %v1647_v24 = vadd.f32 %v1628_v42, %v1405_v15  ;;  %v1887_v36 = vpop.f32.mrf.mxu0  ;;  %v1648_v40 = vadd.f32 %v5300_v14, %v1406_v12  ;;  %v2133_v42 = vadd.f32 %v5302_v50, %v1891_v22  ;;  %v2137_v19 = vadd.f32 %v2123_v11, %v1895_v37 }
 0x1ec   : > { %v2129_v46 = vpop.f32.mrf.mxu1  ;;  %v1897_v39 = vadd.f32 %v1887_v36, %v1652_v45  ;;  %v5304_v3 = vld [vmem:[#allocation33_spill] sm:$0xff] }
 0x1ed   : > { %v1892_v30 = vadd.f32 %v1873_v0, %v1647_v24  ;;  %v1893_v35 = vadd.f32 %v1875_v54, %v1648_v40  ;;  %v2138_v0 = vadd.f32 %v2127_v8, %v1896_v43 }
 0x1ee   : > { %v2139_v61 = vadd.f32 %v2129_v46, %v1897_v39 }
 0x1ef   : > { %v2134_v9 = vadd.f32 %v5303_v60, %v1892_v30  ;;  %v2135_v54 = vadd.f32 %v5304_v3, %v1893_v35 }
 0x21d   : > { %v2351_v1 = vpop.f32.mrf.mxu0 }
 0x21e   : > { %v2363_v34 = vpop.f32.mrf.mxu1  ;;  %v5037_v17 = vadd.f32 %v2351_v1, %v2132_v38 }
 0x21f   : > { %v2353_v41 = vpop.f32.mrf.mxu0  ;;  %v5039_v52 = vadd.f32 %v2363_v34, %v2136_v49 }
 0x220   : > { %v2365_v25 = vpop.f32.mrf.mxu1  ;;  %v5041_v56 = vadd.f32 %v2353_v41, %v2133_v42  ;;  %v2403_v21 = vmul.f32 %v5037_v17, %v5037_v17 }
 0x221   : > { %v2357_v48 = vpop.f32.mrf.mxu0  ;;  %v5046_v23 = vadd.f32 %v2365_v25, %v2137_v19  ;;  %v2407_v5 = vmul.f32 %v5039_v52, %v5039_v52 }
 0x222   : > { %v2369_v59 = vpop.f32.mrf.mxu1  ;;  %v5044_v63 = vadd.f32 %v2357_v48, %v2134_v9  ;;  %v2404_v58 = vmul.f32 %v5041_v56, %v5041_v56 }
 0x223   : > { %v5048_v27 = vadd.f32 %v2369_v59, %v2138_v0  ;;  %v2359_v47 = vpop.f32.mrf.mxu0  ;;  %v2408_v15 = vmul.f32 %v5046_v23, %v5046_v23 }
 0x224   : > { %v2371_v55 = vpop.f32.mrf.mxu1  ;;  %v2382_v33 = vadd.f32 %v5044_v63, %v5037_v17  ;;  %v2405_v2 = vmul.f32 %v5044_v63, %v5044_v63  ;;  %v5056_v11 = vadd.f32 %v2359_v47, %v2135_v54 }
 0x225   : > { %v5062_v7 = vadd.f32 %v2371_v55, %v2139_v61  ;;  %v2409_v31 = vmul.f32 %v5048_v27, %v5048_v27  ;;  %v2472_v61 = vpop.permute.xlu1 %2471  ;;  %v2462_v55 = vpop.permute.xlu0 %2461 }
 0x226   : > { %v2411_v53 = vadd.f32 %v2405_v2, %v2403_v21  ;;  %v2383_v4 = vadd.f32 %v2382_v33, %v5039_v52  ;;  %v2391_v16 = vadd.f32 %v5056_v11, %v5041_v56  ;;  %v2406_v13 = vmul.f32 %v5056_v11, %v5056_v11 }
 0x227   : > { %v2410_v29 = vmul.f32 %v5062_v7, %v5062_v7 }
 0x228   : > { %v2384_v51 = vadd.f32 %v2383_v4, %v5048_v27  ;;  %v2412_v57 = vadd.f32 %v2411_v53, %v2407_v5  ;;  %v2420_v62 = vadd.f32 %v2406_v13, %v2404_v58  ;;  %v2392_v8 = vadd.f32 %v2391_v16, %v5046_v23 }
 0x229   : > { %v2477_v21 = vpop.permute.xlu1 %2476  ;;  %v2467_v33 = vpop.permute.xlu0 %2466 }
 0x22a   : > { %v2385_v12 = vrot.slane %v2384_v51, 4  ;;  %v2413_v6 = vadd.f32 %v2412_v57, %v2409_v31  ;;  %v2393_v18 = vadd.f32 %v2392_v8, %v5062_v7  ;;  %v2421_v20 = vadd.f32 %v2420_v62, %v2408_v15 }
 0x22c   : > { %v2386_v24 = vadd.f32 %v2385_v12, %v2384_v51  ;;  %v2414_v28 = vrot.slane %v2413_v6, 4  ;;  %v2394_v10 = vrot.slane %v2393_v18, 4  ;;  %v2422_v32 = vadd.f32 %v2421_v20, %v2410_v29 }
 0x22d   : > { %v2499_v2 = vpop.permute.xlu1 %2498  ;;  %v2494_v57 = vpop.permute.xlu0 %2493 }
 0x22e   : > { %v2387_v22 = vrot.slane %v2386_v24, 2  ;;  %v2415_v26 = vadd.f32 %v2414_v28, %v2413_v6  ;;  %v2395_v36 = vadd.f32 %v2394_v10, %v2393_v18  ;;  %v2423_v46 = vrot.slane %v2422_v32, 4 }
 0x230   : > { %v2388_v14 = vadd.f32 %v2387_v22, %v2386_v24  ;;  %v2416_v40 = vrot.slane %v2415_v26, 2  ;;  %v2396_v30 = vrot.slane %v2395_v36, 2  ;;  %v2424_v45 = vadd.f32 %v2423_v46, %v2422_v32 }
 0x231   : > { %v2509_v10 = vpop.permute.xlu1 %2508 }
 0x232   : > { %v2389_v37 = vrot.slane %v2388_v14, 1  ;;  %v2417_v43 = vadd.f32 %v2416_v40, %v2415_v26  ;;  %v2397_v1 = vadd.f32 %v2396_v30, %v2395_v36  ;;  %v2425_v34 = vrot.slane %v2424_v45, 2 }
 0x234   : > { %v2390_v44 = vadd.f32 %v2389_v37, %v2388_v14  ;;  %v2418_v38 = vrot.slane %v2417_v43, 1  ;;  %v2398_v35 = vrot.slane %v2397_v1, 1  ;;  %v2426_v50 = vadd.f32 %v2425_v34, %v2424_v45 }
 0x236   : > { %v2401_v42 = vmul.f32 0.03125, %v2390_v44  ;;  %v2419_v49 = vadd.f32 %v2418_v38, %v2417_v43  ;;  %v2399_v39 = vadd.f32 %v2398_v35, %v2397_v1  ;;  %v2427_v41 = vrot.slane %v2426_v50, 1 }
 0x238   : > { %v2429_v25 = vmul.f32 0.03125, %v2419_v49  ;;  %v2431_v60 = vmul.f32 %v2401_v42, %v2401_v42  ;;  %v2402_v9 = vmul.f32 0.03125, %v2399_v39  ;;  %v2428_v19 = vadd.f32 %v2427_v41, %v2426_v50 }
 0x239   : > { %v2441_v5 = vsub.f32 %v5048_v27, %v2401_v42  ;;  %v2439_v58 = vsub.f32 %v5039_v52, %v2401_v42  ;;  %v2435_v53 = vsub.f32 %v5037_v17, %v2401_v42  ;;  %v2437_v4 = vsub.f32 %v5044_v63, %v2401_v42 }
 0x23a   : > { %v2433_v0 = vsub.f32 %v2429_v25, %v2431_v60  ;;  %v2432_v48 = vmul.f32 %v2402_v9, %v2402_v9  ;;  %v2430_v59 = vmul.f32 0.03125, %v2428_v19  ;;  %v2442_v62 = vsub.f32 %v5062_v7, %v2402_v9 }
 0x23b   : > { %v2440_v8 = vsub.f32 %v5046_v23, %v2402_v9  ;;  %v2436_v29 = vsub.f32 %v5041_v56, %v2402_v9  ;;  %v2438_v27 = vsub.f32 %v5056_v11, %v2402_v9  ;;  %v2504_v11 = vpop.permute.xlu0 %2503 }
 0x23c   : > { %v2443_v3 = vadd.f32 1e-05, %v2433_v0  ;;  %v2434_v54 = vsub.f32 %v2430_v59, %v2432_v48 }
 0x23e   : > { %3680 = vrsqrt.f32 %v2443_v3  ;;  %v2444_v47 = vadd.f32 1e-05, %v2434_v54 }
 0x240   : > { %3682 = vrsqrt.f32 %v2444_v47 }
 0x24b   : > { %v3681_v16 = vpop.eup %3680 }
 0x24c   : > { %v2451_v13 = vmul.f32 %v3681_v16, %v2439_v58  ;;  %v2447_v15 = vmul.f32 %v3681_v16, %v2435_v53  ;;  %v2453_v31 = vmul.f32 %v3681_v16, %v2441_v5  ;;  %v2449_v51 = vmul.f32 %v3681_v16, %v2437_v4 }
 0x24d   : > { %v3683_v12 = vpop.eup %3682 }
 0x24e   : > { %v2483_v52 = vmul.f32 %v2472_v61, %v2451_v13  ;;  %v2479_v6 = vmul.f32 %v2462_v55, %v2447_v15  ;;  %v2485_v17 = vmul.f32 %v2477_v21, %v2453_v31  ;;  %v2481_v18 = vmul.f32 %v2467_v33, %v2449_v51 }
 0x24f   : > { %v2452_v63 = vmul.f32 %v3683_v12, %v2440_v8  ;;  %v2448_v20 = vmul.f32 %v3683_v12, %v2436_v29  ;;  %v2454_v24 = vmul.f32 %v3683_v12, %v2442_v62  ;;  %v2450_v28 = vmul.f32 %v3683_v12, %v2438_v27 }
 0x250   : > { %v2513_v32 = vadd.f32 %v2499_v2, %v2481_v18  ;;  %v2511_v22 = vadd.f32 %v2494_v57, %v2479_v6  ;;  %v2517_v26 = vadd.f32 %v2509_v10, %v2485_v17  ;;  %v2515_v37 = vadd.f32 %v2504_v11, %v2483_v52 }
 0x251   : > { %v2484_v7 = vmul.f32 %v2472_v61, %v2452_v63  ;;  %v2480_v36 = vmul.f32 %v2462_v55, %v2448_v20  ;;  %v2486_v23 = vmul.f32 %v2477_v21, %v2454_v24  ;;  %v2482_v46 = vmul.f32 %v2467_v33, %v2450_v28 }
 0x252   : > { %v2529_v56 = vmul.f32 0.70710677, %v2513_v32  ;;  %v2527_v14 = vmul.f32 0.70710677, %v2511_v22  ;;  %v2533_v44 = vmul.f32 0.70710677, %v2517_v26 }
 0x253   : > { %v2514_v40 = vadd.f32 %v2499_v2, %v2482_v46  ;;  %v2512_v30 = vadd.f32 %v2494_v57, %v2480_v36  ;;  %v2518_v45 = vadd.f32 %v2509_v10, %v2486_v23  ;;  %v2516_v43 = vadd.f32 %v2504_v11, %v2484_v7 }
 0x254   : > { %3684 = verf.f32 %v2529_v56  ;;  %v2531_v35 = vmul.f32 0.70710677, %v2515_v37  ;;  %v2521_v49 = vmul.f32 0.5, %v2513_v32  ;;  %v2519_v9 = vmul.f32 0.5, %v2511_v22 }
 0x255   : > { %v2530_v1 = vmul.f32 0.70710677, %v2514_v40  ;;  %v2528_v34 = vmul.f32 0.70710677, %v2512_v30  ;;  %3686 = verf.f32 %v2527_v14  ;;  %v2534_v38 = vmul.f32 0.70710677, %v2518_v45 }
 0x256   : > { %v2532_v50 = vmul.f32 0.70710677, %v2516_v43  ;;  %v2522_v48 = vmul.f32 0.5, %v2514_v40  ;;  %v2520_v54 = vmul.f32 0.5, %v2512_v30  ;;  %v2525_v33 = vmul.f32 0.5, %v2517_v26 }
 0x257   : > { %3688 = verf.f32 %v2530_v1  ;;  %v2526_v53 = vmul.f32 0.5, %v2518_v45  ;;  %v2523_v15 = vmul.f32 0.5, %v2515_v37  ;;  %v2524_v57 = vmul.f32 0.5, %v2516_v43 }
 0x258   : > { %3690 = verf.f32 %v2528_v34 }
 0x259   : > { %3692 = verf.f32 %v2533_v44 }
 0x25a   : > { %3694 = verf.f32 %v2534_v38 }
 0x25b   : > { %3696 = verf.f32 %v2531_v35 }
 0x25c   : > { %3698 = verf.f32 %v2532_v50 }
 0x261   : > { %v3685_v42 = vpop.eup %3684 }
 0x262   : > { %v2545_v39 = vadd.f32 1.0, %v3685_v42  ;;  %v3687_v41 = vpop.eup %3686 }
 0x263   : > { %v2543_v19 = vadd.f32 1.0, %v3687_v41 }
 0x264   : > { %v3689_v25 = vpop.eup %3688  ;;  %v2553_v60 = vmul.f32 %v2545_v39, %v2521_v49 }
 0x265   : > { %v3691_v0 = vpop.eup %3690  ;;  %v2546_v59 = vadd.f32 1.0, %v3689_v25  ;;  %v2551_v47 = vmul.f32 %v2543_v19, %v2519_v9 }
 0x266   : > { %v3693_v3 = vpop.eup %3692  ;;  %2561 = vst [vmem:[%s5089_s30 + $0x10] sm:$0xff] %v2553_v60  ;;  %v2544_v61 = vadd.f32 1.0, %v3691_v0 }
 0x267   : > { %v3695_v55 = vpop.eup %3694  ;;  %v2554_v21 = vmul.f32 %v2546_v59, %v2522_v48  ;;  %v2549_v2 = vadd.f32 1.0, %v3693_v3  ;;  %2559 = vst [vmem:[%s5089_s30] sm:$0xff] %v2551_v47 }
 0x268   : > { %v3697_v5 = vpop.eup %3696  ;;  %v2552_v58 = vmul.f32 %v2544_v61, %v2520_v54  ;;  %v2550_v4 = vadd.f32 1.0, %v3695_v55 }
 0x269   : > { %v3699_v16 = vpop.eup %3698  ;;  %2562 = vst [vmem:[%s5089_s30 + $0x18] sm:$0xff] %v2554_v21  ;;  %v2557_v13 = vmul.f32 %v2549_v2, %v2525_v33  ;;  %v2547_v31 = vadd.f32 1.0, %v3697_v5 }
 0x26a   : > { %2560 = vst [vmem:[%s5089_s30 + $0x8] sm:$0xff] %v2552_v58  ;;  %v2558_v51 = vmul.f32 %v2550_v4, %v2526_v53  ;;  %v2548_v62 = vadd.f32 1.0, %v3699_v16 }
 0x26b   : > { %2565 = vst [vmem:[%s5089_s30 + $0x30] sm:$0xff] %v2557_v13  ;;  %v2555_v8 = vmul.f32 %v2547_v31, %v2523_v15 }
 0x26c   : > { %2566 = vst [vmem:[%s5089_s30 + $0x38] sm:$0xff] %v2558_v51  ;;  %v2556_v29 = vmul.f32 %v2548_v62, %v2524_v57 }
 0x26d   : > { %2563 = vst [vmem:[%s5089_s30 + $0x20] sm:$0xff] %v2555_v8 }
 0x26e   : > { %2564 = vst [vmem:[%s5089_s30 + $0x28] sm:$0xff] %v2556_v29 }
 0x26f   : > { %3713 = shalt.err (!%p3710_p5)
}
 0x270   : > { %s3714_s21 = scalar_lea.hbm %s5101_s18, 1024  ;;  %s3718_s26 = scalar_lea.hbm %s5159_s4, 2048 }
 0x271   : > { %p3715_p6 = scmp.ne.s32.totalorder %s5101_s18, %s3714_s21  ;;  %p3719_p10 = scmp.lt.s32.totalorder %s5101_s18, %s5159_s4 }
 0x272   : > { %p3720_p11 = scmp.lt.s32.totalorder %s3718_s26, %s3714_s21 }
 0x273   : > { %p3716_p7 = pnand %p3715_p6, %p3847_p4 }
 0x274   : > { %p3721_p12 = por %p3720_p11, %p3719_p10 }
 0x275   : > { %p3717_p9 = pneg %p3716_p7 }
 0x277   : > { %p3722_p13 = pnand %p3721_p12, %p3717_p9 }
 0x279   : > { %3725 = shalt.err (!%p3722_p13)
}
 0x27a   : > { %s3780_s30 = smov 256   ;;  %s3781_s5 = smov 16  }
 0x27b   : > { %3620 = dma.vmem_to_hbm [thread:$0]  (%p3847_p4), %s5103_s6, 1024, %s5101_s18, %s5110_s9, %s3780_s30, %s3780_s30, %s3781_s5  }
 0x27c PF: > { %p3626_p0 = scmp.ge.s32.totalorder %s3776_s20, 2  ;;  %s2598_s7 = sand.u32 1, %s3756_s15  }
 0x27d   : > { %s2599_s8 = scalar_lea.sflag [#allocation3], %s2598_s7 }
 0x27e   : > { %p3623_p1 = pnand %p3626_p0, %p3854_p8 }
 0x280   : > { %p3624_p2 = pneg %p3623_p1 }
 0x282   : > { %3751 = dma.done.wait (%p3624_p2), %s2599_s8, 1024  }
 0x283   : > { %3753 = vsyncadd (%p3624_p2), %s2599_s8, 4294966272  ;;  %s17_s20 = sadd.s32 1, %s3776_s20   ;;  %s5305_s15 = smov %s3760_s16 }
 0x284   : > { %p14_p3 = scmp.ge.s32.totalorder %s17_s20, 4   ;;  %s5306_s16 = smov %s3764_s17 }
 0x285   : > { %s5307_s17 = smov %s3860_s28  ;;  %s5308_s18 = smov %s3772_s19 }
 0x286   : > { %s5309_s19 = smov %s5311_s23  ;;  %16 = sbr.rel (!%p14_p3) target bundleno = 4 (0x4), region = 82 }
 0x28b   :  { %2604 = vsyncpa [#allocation3], 1 }
 0x28c   :  { %2606 = vsyncpa [#allocation3 + $0x1], 1 }

</bundles_post_ra>
